<compile_context>
chip_gen: v7x
topology: tpu7x:2x2x1
jax: 0.10.0
libtpu: 0.0.40
codegen_flags: <defaults>
</compile_context>

<pallas_src>
import functools

import jax
import jax.numpy as jnp
from jax import lax
from jax.experimental import pallas as pl
from jax.experimental.pallas import tpu as pltpu


# ----------------------------------------------------------------------------
# Fused kernel: B images per grid step; activations stay in VMEM/vregs.
# ----------------------------------------------------------------------------
def _mbconv_kernel(*refs, meta):
    (B, K, stride, pad, H, Hp, Ho, Wc, Wo, mid, oup, Cin,
     expand, has_se, use_res) = meta

    it = iter(refs)
    x_ref = next(it)
    if expand:
        wexp_ref = next(it)
        sh1_ref = next(it)
    wdw_ref = next(it)
    sh2_ref = next(it)
    if has_se:
        wse1_ref = next(it)
        bse1_ref = next(it)
        wse2_ref = next(it)
        bse2_ref = next(it)
    wproj_ref = next(it)
    sh3_ref = next(it)
    o_ref = next(it)

    Lx = x_ref.shape[-1]
    x2d = x_ref[...].reshape(B * Hp, Lx)                 # f32, lane-dense slab

    # ---- expand 1x1 conv (block-diagonal bf16 MXU matmul) + folded BN + swish
    if expand:
        h = jnp.dot(x2d.astype(jnp.bfloat16), wexp_ref[...],
                    preferred_element_type=jnp.float32) + sh1_ref[...]
        h = h * jax.nn.sigmoid(h)                        # swish in f32 (VPU/EUP)
    else:
        h = x2d                                          # wrapper zero-padded H & W

    w_dw = wdw_ref[...]                                  # (K*K, Wc*mid) f32
    sh2 = sh2_ref[...]

    # ---- depthwise KxK as K*K f32 VPU MACs on shifted slices -----------------
    accs = []
    for b in range(B):
        hb = h[b * Hp:(b + 1) * Hp, :]
        if expand:
            # zero the padded halo rows so the depthwise sees exact zero padding
            rid = lax.broadcasted_iota(jnp.int32, hb.shape, 0)
            hb = jnp.where((rid >= pad) & (rid < pad + H), hb, 0.0)
        acc = jnp.zeros((Ho, Wc * mid), jnp.float32)
        for kh in range(K):
            for kw in range(K):
                if stride == 1:
                    rows = hb[kh:kh + Ho, kw * mid:kw * mid + Wc * mid]
                else:
                    rows = lax.slice(hb, (kh, kw * mid),
                                     (kh + (Ho - 1) * stride + 1,
                                      kw * mid + Wc * mid),
                                     (stride, 1))
                acc = acc + rows * w_dw[kh * K + kw:kh * K + kw + 1, :]
        acc = acc + sh2
        acc = acc * jax.nn.sigmoid(acc)                  # swish in f32
        accs.append(acc)

    # ---- squeeze & excite (spatial pool + column-select folded into FC1) -----
    if has_se:
        pooled = [jnp.sum(a, axis=0, keepdims=True) for a in accs]
        pooled = pooled[0] if B == 1 else jnp.concatenate(pooled, axis=0)
        s = jnp.dot(pooled.astype(jnp.bfloat16), wse1_ref[...],
                    preferred_element_type=jnp.float32) + bse1_ref[...]
        s = s * jax.nn.sigmoid(s)
        g = jnp.dot(s.astype(jnp.bfloat16), wse2_ref[...],
                    preferred_element_type=jnp.float32) + bse2_ref[...]
        g = jax.nn.sigmoid(g)                            # (B, Wc*mid) lane-dense gate
        accs = [accs[b] * g[b:b + 1, :] for b in range(B)]

    # ---- projection 1x1 (block-diag bf16 MXU matmul) + folded BN (+ residual) -
    acc_all = accs[0] if B == 1 else jnp.concatenate(accs, axis=0)
    out = jnp.dot(acc_all.astype(jnp.bfloat16), wproj_ref[...],
                  preferred_element_type=jnp.float32) + sh3_ref[...]
    if use_res:
        # residual read from the resident input block (stride==1, Cin==oup)
        if expand:
            res = [x2d[b * Hp + pad:b * Hp + pad + H, :] for b in range(B)]
        else:
            res = [x2d[b * Hp + pad:b * Hp + pad + H,
                       pad * Cin:pad * Cin + Wo * Cin] for b in range(B)]
        res = res[0] if B == 1 else jnp.concatenate(res, axis=0)
        out = out + res
    o_ref[...] = out.reshape(B, Ho, Wo * oup).astype(o_ref.dtype)


# ----------------------------------------------------------------------------
# Host-side geometry + operand construction (called ONCE at init)
# ----------------------------------------------------------------------------
def _geometry(cfg, H, W):
    K, stride, mid = cfg["k"], cfg["stride"], cfg["mid"]
    pad = K // 2
    Hp, Wp = H + 2 * pad, W + 2 * pad
    Ho = (Hp - K) // stride + 1
    Wo = (Wp - K) // stride + 1
    Wc = Wp - K + 1                      # depthwise computed at stride 1 in W
    Cpad = ((Wp * mid + 127) // 128) * 128
    return pad, Hp, Wp, Ho, Wo, Wc, Cpad


def build_operands(p, cfg, H, W):
    """BN-folded, lane-dense, bf16 MXU weights.  Build once, reuse per forward."""
    mid, oup, Cin = cfg["mid"], cfg["oup"], cfg["inp"]
    K, stride = cfg["k"], cfg["stride"]
    pad, Hp, Wp, Ho, Wo, Wc, Cpad = _geometry(cfg, H, W)
    bf = jnp.bfloat16
    ops = {}

    if cfg["expand_ratio"] != 1:
        w_exp_f = p["w_exp"] * p["bn1_scale"]                         # (Cin, mid)
        shiftmat = jnp.pad(jnp.eye(W, dtype=jnp.float32), ((0, 0), (pad, pad)))
        w_bd = jnp.kron(shiftmat, w_exp_f)                            # (W*Cin, Wp*mid)
        ops["w_exp_bd"] = jnp.pad(w_bd, ((0, 0), (0, Cpad - Wp * mid))).astype(bf)
        sh1 = jnp.tile(p["bn1_shift"], (1, W))                        # (1, W*mid)
        ops["sh1"] = jnp.pad(sh1, ((0, 0), (pad * mid, Cpad - (pad + W) * mid)))

    # depthwise: per-tap channel vectors (VPU MAC weights), BN2 scale folded in
    w_dw_f = p["w_dw"] * p["bn2_scale"][0]                            # (K, K, mid)
    ops["w_dw_vec"] = jnp.stack(
        [jnp.tile(w_dw_f[kh, kw], Wc) for kh in range(K) for kw in range(K)], 0)
    ops["sh2"] = jnp.tile(p["bn2_shift"], (1, Wc))                    # (1, Wc*mid)

    if cfg["has_se"]:
        S = cfg["se_size"]
        S_pad = ((S + 127) // 128) * 128
        eye_m = jnp.eye(mid, dtype=jnp.float32)
        # spatial mean-pool over the strided output columns, folded into FC1
        sel = jnp.zeros((Wc,), jnp.float32).at[jnp.arange(Wo) * stride].set(
            1.0 / (Ho * Wo))
        pool = jnp.kron(sel[:, None], eye_m)                          # (Wc*mid, mid)
        tile = jnp.kron(jnp.ones((1, Wc), jnp.float32), eye_m)        # (mid, Wc*mid)
        ops["w_se1"] = jnp.pad(pool @ p["w_se1"],
                               ((0, 0), (0, S_pad - S))).astype(bf)   # (Wc*mid, S_pad)
        ops["b_se1"] = jnp.pad(p["b_se1"], ((0, 0), (0, S_pad - S)))
        ops["w_se2"] = jnp.pad(p["w_se2"] @ tile,
                               ((0, S_pad - S), (0, 0))).astype(bf)   # (S_pad, Wc*mid)
        ops["b_se2"] = p["b_se2"] @ tile                              # (1, Wc*mid)

    # projection 1x1: block-diagonal with the stride column-selection folded in
    selmat = jnp.zeros((Wc, Wo), jnp.float32).at[
        jnp.arange(Wo) * stride, jnp.arange(Wo)].set(1.0)
    w_proj_f = p["w_proj"] * p["bn3_scale"]                           # (mid, oup)
    ops["w_proj_bd"] = jnp.kron(selmat, w_proj_f).astype(bf)          # (Wc*mid, Wo*oup)
    ops["sh3"] = jnp.tile(p["bn3_shift"], (1, Wo))                    # (1, Wo*oup)
    return ops


# ----------------------------------------------------------------------------
# MBConvBlock forward (eval mode)
# ----------------------------------------------------------------------------
def mbconv_forward(x_nchw, ops, cfg):
    N, Cin, H, W = x_nchw.shape
    mid, oup = cfg["mid"], cfg["oup"]
    K, stride = cfg["k"], cfg["stride"]
    expand = cfg["expand_ratio"] != 1
    has_se = cfg["has_se"]
    use_res = cfg["id_skip"] and cfg["use_res_connect"]
    pad, Hp, Wp, Ho, Wo, Wc, Cpad = _geometry(cfg, H, W)

    x = jnp.transpose(x_nchw, (0, 2, 3, 1))                           # NCHW -> NHWC

    # Lane-dense f32 input slab (kept f32 so the in-kernel residual is exact;
    # it is cast to bf16 only at the MXU input inside the kernel).
    if expand:
        x_in = jnp.pad(x, ((0, 0), (pad, pad), (0, 0), (0, 0)))
        x_in = x_in.reshape(N, Hp, W * Cin)
    else:
        x_in = jnp.pad(x, ((0, 0), (pad, pad), (pad, pad), (0, 0)))
        x_in = x_in.reshape(N, Hp, Wp * Cin)
        x_in = jnp.pad(x_in, ((0, 0), (0, 0), (0, Cpad - Wp * Cin)))
    Lx = x_in.shape[-1]

    # Images fused per grid step: batch only while keeping >= 2 grid steps so
    # both v7x TensorCores get work (no effect on single-TC v5e/v6e).
    B = 1
    for cand in (4, 2):
        if N % cand == 0 and N // cand >= 2:
            B = cand
            break

    def const_spec(a):
        # constant block index across the grid -> weight stays resident in VMEM
        return pl.BlockSpec(a.shape, lambda n: (0, 0))

    args = [x_in]
    in_specs = [pl.BlockSpec((B, Hp, Lx), lambda n: (n, 0, 0))]
    if expand:
        args += [ops["w_exp_bd"], ops["sh1"]]
        in_specs += [const_spec(ops["w_exp_bd"]), const_spec(ops["sh1"])]
    args += [ops["w_dw_vec"], ops["sh2"]]
    in_specs += [const_spec(ops["w_dw_vec"]), const_spec(ops["sh2"])]
    if has_se:
        args += [ops["w_se1"], ops["b_se1"], ops["w_se2"], ops["b_se2"]]
        in_specs += [const_spec(ops[k]) for k in ("w_se1", "b_se1", "w_se2", "b_se2")]
    args += [ops["w_proj_bd"], ops["sh3"]]
    in_specs += [const_spec(ops["w_proj_bd"]), const_spec(ops["sh3"])]

    meta = (B, K, stride, pad, H, Hp, Ho, Wc, Wo, mid, oup, Cin,
            expand, has_se, use_res)
    kernel = functools.partial(_mbconv_kernel, meta=meta)

    out = pl.pallas_call(
        kernel,
        out_shape=jax.ShapeDtypeStruct((N, Ho, Wo * oup), x.dtype),
        grid=(N // B,),
        in_specs=in_specs,
        out_specs=pl.BlockSpec((B, Ho, Wo * oup), lambda n: (n, 0, 0)),
        compiler_params=pltpu.CompilerParams(
            dimension_semantics=("parallel",),
            vmem_limit_bytes=32 * 1024 * 1024),
    )(*args)

    out = out.reshape(N, Ho, Wo, oup)
    return jnp.transpose(out, (0, 3, 1, 2))                           # NHWC -> NCHW


# ----------------------------------------------------------------------------
# Pure-JAX reference (for verification)
# ----------------------------------------------------------------------------
def reference_forward(x_nchw, p, cfg):
    hp = lax.Precision.HIGHEST
    x = jnp.transpose(x_nchw, (0, 2, 3, 1)).astype(jnp.float32)
    h = x
    if cfg["expand_ratio"] != 1:
        h = jnp.einsum("nhwc,cd->nhwd", h, p["w_exp"], precision=hp)
        h = h * p["bn1_scale"][0] + p["bn1_shift"][0]
        h = h * jax.nn.sigmoid(h)
    pad = cfg["k"] // 2
    h = lax.conv_general_dilated(
        h, p["w_dw"][:, :, None, :], window_strides=(cfg["stride"], cfg["stride"]),
        padding=[(pad, pad), (pad, pad)],
        dimension_numbers=("NHWC", "HWIO", "NHWC"),
        feature_group_count=cfg["mid"], precision=hp)
    h = h * p["bn2_scale"][0] + p["bn2_shift"][0]
    h = h * jax.nn.sigmoid(h)
    if cfg["has_se"]:
        pooled = jnp.mean(h, axis=(1, 2))
        s = jnp.dot(pooled, p["w_se1"], precision=hp) + p["b_se1"][0]
        s = s * jax.nn.sigmoid(s)
        s = jnp.dot(s, p["w_se2"], precision=hp) + p["b_se2"][0]
        s = jax.nn.sigmoid(s)
        h = h * s[:, None, None, :]
    out = jnp.einsum("nhwc,cd->nhwd", h, p["w_proj"], precision=hp)
    out = out * p["bn3_scale"][0] + p["bn3_shift"][0]
    if cfg["id_skip"] and cfg["use_res_connect"]:
        out = out + x
    return jnp.transpose(out, (0, 3, 1, 2))


# ----------------------------------------------------------------------------
# Deterministic parameter init (BN running stats pre-folded to scale/shift)
# ----------------------------------------------------------------------------
def fold_bn(gamma, beta, mean, var, eps=1e-5):
    scale = gamma / jnp.sqrt(var + eps)
    shift = beta - mean * scale
    return scale.reshape(1, -1), shift.reshape(1, -1)


def init_params(key, cfg):
    inp, mid, oup, k, se = cfg["inp"], cfg["mid"], cfg["oup"], cfg["k"], cfg["se_size"]
    ks = jax.random.split(key, 24)
    nrm = lambda i, shp, s=0.1: jax.random.normal(ks[i], shp, jnp.float32) * s
    uni = lambda i, shp: jax.random.uniform(ks[i], shp, jnp.float32, 0.5, 1.5)

    p = {}
    # expand 1x1 conv (torch weight (mid, inp, 1, 1)) stored as (inp, mid)
    p["w_exp"] = nrm(0, (inp, mid), 0.2)
    p["bn1_scale"], p["bn1_shift"] = fold_bn(uni(1, (mid,)), nrm(2, (mid,)),
                                             nrm(3, (mid,)), uni(4, (mid,)))
    # depthwise conv (torch weight (mid, 1, k, k)) stored as (k, k, mid)
    p["w_dw"] = nrm(5, (k, k, mid), 0.2)
    p["bn2_scale"], p["bn2_shift"] = fold_bn(uni(6, (mid,)), nrm(7, (mid,)),
                                             nrm(8, (mid,)), uni(9, (mid,)))
    # SE block (with biases)
    p["w_se1"] = nrm(10, (mid, se), 0.2)
    p["b_se1"] = nrm(11, (1, se), 0.1)
    p["w_se2"] = nrm(12, (se, mid), 0.2)
    p["b_se2"] = nrm(13, (1, mid), 0.1)
    # projection 1x1 conv (torch weight (oup, mid, 1, 1)) stored as (mid, oup)
    p["w_proj"] = nrm(14, (mid, oup), 0.2)
    p["bn3_scale"], p["bn3_shift"] = fold_bn(uni(15, (oup,)), nrm(16, (oup,)),
                                             nrm(17, (oup,)), uni(18, (oup,)))
    return p


# ----------------------------------------------------------------------------
if __name__ == "__main__":
    # block_args: input_filters=8, output_filters=8, expand_ratio=2,
    #             kernel_size=3, strides=(1,1), se_ratio=0.25, id_skip=True
    inp, oup, expand_ratio, ksz, stride, se_ratio = 8, 8, 2, 3, 1, 0.25
    cfg = dict(
        inp=inp, oup=oup, expand_ratio=expand_ratio, mid=inp * expand_ratio,
        k=ksz, stride=stride, se_size=max(1, int(inp * se_ratio)),
        has_se=True, id_skip=True,
        use_res_connect=(stride == 1 and inp == oup),
    )

    key = jax.random.PRNGKey(0)
    kx, kp = jax.random.split(key)
    x = jax.random.normal(kx, (2, inp, 16, 16), jnp.float32)   # NCHW like PyTorch
    params = init_params(kp, cfg)

    # Operand construction happens once at init (review: cache the build).
    ops = build_operands(params, cfg, H=16, W=16)

    out = jax.block_until_ready(mbconv_forward(x, ops, cfg))
    ref = jax.block_until_ready(reference_forward(x, params, cfg))

    assert out.shape == (2, oup, 16, 16), out.shape
    err = float(jnp.max(jnp.abs(out - ref)))
    # Tolerance re-derived for bf16 MXU operands (reference uses HIGHEST f32).
    assert jnp.allclose(out, ref, rtol=2e-2, atol=2e-2), err
    print("KERNEL_OK")
</pallas_src>

<mosaic_0001>
module attributes {stable_mosaic.version = 11 : i64} {
  func.func @_mbconv_kernel(%arg0: i32, %arg1: memref<1x18x128xf32, #tpu.memory_space<vmem>>, %arg2: memref<128x384xbf16, #tpu.memory_space<vmem>>, %arg3: memref<1x384xf32, #tpu.memory_space<vmem>>, %arg4: memref<9x256xf32, #tpu.memory_space<vmem>>, %arg5: memref<1x256xf32, #tpu.memory_space<vmem>>, %arg6: memref<256x128xbf16, #tpu.memory_space<vmem>>, %arg7: memref<1x128xf32, #tpu.memory_space<vmem>>, %arg8: memref<128x256xbf16, #tpu.memory_space<vmem>>, %arg9: memref<1x256xf32, #tpu.memory_space<vmem>>, %arg10: memref<256x128xbf16, #tpu.memory_space<vmem>>, %arg11: memref<1x128xf32, #tpu.memory_space<vmem>>, %arg12: memref<1x16x128xf32, #tpu.memory_space<vmem>>) attributes {dimension_semantics = [#tpu.dimension_semantics<parallel>], iteration_bounds = array<i64: 2>, scalar_prefetch = 0 : i64, scratch_operands = 0 : i64, tpu.core_type = #tpu.core_type<tc>, window_params = [{transform_indices = @transform_0, window_bounds = array<i64: 1, 18, 128>}, {pipeline_mode = #tpu.pipeline_mode<synchronous>, transform_indices = @transform_1, window_bounds = array<i64: 128, 384>}, {pipeline_mode = #tpu.pipeline_mode<synchronous>, transform_indices = @transform_2, window_bounds = array<i64: 1, 384>}, {pipeline_mode = #tpu.pipeline_mode<synchronous>, transform_indices = @transform_3, window_bounds = array<i64: 9, 256>}, {pipeline_mode = #tpu.pipeline_mode<synchronous>, transform_indices = @transform_4, window_bounds = array<i64: 1, 256>}, {pipeline_mode = #tpu.pipeline_mode<synchronous>, transform_indices = @transform_5, window_bounds = array<i64: 256, 128>}, {pipeline_mode = #tpu.pipeline_mode<synchronous>, transform_indices = @transform_6, window_bounds = array<i64: 1, 128>}, {pipeline_mode = #tpu.pipeline_mode<synchronous>, transform_indices = @transform_7, window_bounds = array<i64: 128, 256>}, {pipeline_mode = #tpu.pipeline_mode<synchronous>, transform_indices = @transform_8, window_bounds = array<i64: 1, 256>}, {pipeline_mode = #tpu.pipeline_mode<synchronous>, transform_indices = @transform_9, window_bounds = array<i64: 256, 128>}, {pipeline_mode = #tpu.pipeline_mode<synchronous>, transform_indices = @transform_10, window_bounds = array<i64: 1, 128>}, {transform_indices = @transform_11, window_bounds = array<i64: 1, 16, 128>}]} {
    %c0 = arith.constant 0 : index
    %c0_0 = arith.constant 0 : index
    %c0_1 = arith.constant 0 : index
    %0 = vector.load %arg1[%c0, %c0_0, %c0_1] : memref<1x18x128xf32, #tpu.memory_space<vmem>>, vector<1x18x128xf32>
    %1 = vector.shape_cast %0 : vector<1x18x128xf32> to vector<18x128xf32>
    %2 = arith.truncf %1 : vector<18x128xf32> to vector<18x128xbf16>
    %c0_2 = arith.constant 0 : index
    %c0_3 = arith.constant 0 : index
    %3 = vector.load %arg2[%c0_2, %c0_3] : memref<128x384xbf16, #tpu.memory_space<vmem>>, vector<128x384xbf16>
    %cst = arith.constant dense<0.000000e+00> : vector<18x384xf32>
    %4 = tpu.matmul %2, %3, %cst {dimension_numbers = #tpu.dot_dimension_numbers<[1], [0], [0], [1], [0, 0, 1, 1], [], []>} : vector<18x128xbf16>, vector<128x384xbf16>, vector<18x384xf32> -> vector<18x384xf32>
    %c0_4 = arith.constant 0 : index
    %c0_5 = arith.constant 0 : index
    %5 = vector.load %arg3[%c0_4, %c0_5] : memref<1x384xf32, #tpu.memory_space<vmem>>, vector<1x384xf32>
    %6 = vector.broadcast %5 : vector<1x384xf32> to vector<18x384xf32>
    %7 = arith.addf %4, %6 : vector<18x384xf32>
    %8 = arith.negf %7 : vector<18x384xf32>
    %9 = math.exp %8 : vector<18x384xf32>
    %cst_6 = arith.constant 1.000000e+00 : f32
    %10 = vector.broadcast %cst_6 : f32 to vector<18x384xf32>
    %11 = arith.addf %10, %9 : vector<18x384xf32>
    %12 = arith.divf %10, %11 : vector<18x384xf32>
    %13 = arith.mulf %7, %12 : vector<18x384xf32>
    %c0_7 = arith.constant 0 : index
    %c0_8 = arith.constant 0 : index
    %14 = vector.load %arg4[%c0_7, %c0_8] : memref<9x256xf32, #tpu.memory_space<vmem>>, vector<9x256xf32>
    %c0_9 = arith.constant 0 : index
    %c0_10 = arith.constant 0 : index
    %15 = vector.load %arg5[%c0_9, %c0_10] : memref<1x256xf32, #tpu.memory_space<vmem>>, vector<1x256xf32>
    %16 = tpu.iota {dimensions = array<i32: 0>} : vector<18x384xi32>
    %c1_i32 = arith.constant 1 : i32
    %17 = vector.broadcast %c1_i32 : i32 to vector<18x384xi32>
    %18 = arith.cmpi sge, %16, %17 : vector<18x384xi32>
    %c17_i32 = arith.constant 17 : i32
    %19 = vector.broadcast %c17_i32 : i32 to vector<18x384xi32>
    %20 = arith.cmpi slt, %16, %19 : vector<18x384xi32>
    %21 = arith.andi %18, %20 : vector<18x384xi1>
    %cst_11 = arith.constant 0.000000e+00 : f32
    %22 = vector.broadcast %cst_11 : f32 to vector<18x384xf32>
    %23 = arith.select %21, %13, %22 : vector<18x384xi1>, vector<18x384xf32>
    %cst_12 = arith.constant 0.000000e+00 : f32
    %24 = vector.broadcast %cst_12 : f32 to vector<16x256xf32>
    %25 = vector.extract_strided_slice %23 {offsets = [0, 0], sizes = [16, 256], strides = [1, 1]} : vector<18x384xf32> to vector<16x256xf32>
    %26 = vector.extract_strided_slice %14 {offsets = [0, 0], sizes = [1, 256], strides = [1, 1]} : vector<9x256xf32> to vector<1x256xf32>
    %27 = vector.broadcast %26 : vector<1x256xf32> to vector<16x256xf32>
    %28 = arith.mulf %25, %27 : vector<16x256xf32>
    %29 = arith.addf %24, %28 : vector<16x256xf32>
    %30 = vector.extract_strided_slice %23 {offsets = [0, 16], sizes = [16, 256], strides = [1, 1]} : vector<18x384xf32> to vector<16x256xf32>
    %31 = vector.extract_strided_slice %14 {offsets = [1, 0], sizes = [1, 256], strides = [1, 1]} : vector<9x256xf32> to vector<1x256xf32>
    %32 = vector.broadcast %31 : vector<1x256xf32> to vector<16x256xf32>
    %33 = arith.mulf %30, %32 : vector<16x256xf32>
    %34 = arith.addf %29, %33 : vector<16x256xf32>
    %35 = vector.extract_strided_slice %23 {offsets = [0, 32], sizes = [16, 256], strides = [1, 1]} : vector<18x384xf32> to vector<16x256xf32>
    %36 = vector.extract_strided_slice %14 {offsets = [2, 0], sizes = [1, 256], strides = [1, 1]} : vector<9x256xf32> to vector<1x256xf32>
    %37 = vector.broadcast %36 : vector<1x256xf32> to vector<16x256xf32>
    %38 = arith.mulf %35, %37 : vector<16x256xf32>
    %39 = arith.addf %34, %38 : vector<16x256xf32>
    %40 = vector.extract_strided_slice %23 {offsets = [1, 0], sizes = [16, 256], strides = [1, 1]} : vector<18x384xf32> to vector<16x256xf32>
    %41 = vector.extract_strided_slice %14 {offsets = [3, 0], sizes = [1, 256], strides = [1, 1]} : vector<9x256xf32> to vector<1x256xf32>
    %42 = vector.broadcast %41 : vector<1x256xf32> to vector<16x256xf32>
    %43 = arith.mulf %40, %42 : vector<16x256xf32>
    %44 = arith.addf %39, %43 : vector<16x256xf32>
    %45 = vector.extract_strided_slice %23 {offsets = [1, 16], sizes = [16, 256], strides = [1, 1]} : vector<18x384xf32> to vector<16x256xf32>
    %46 = vector.extract_strided_slice %14 {offsets = [4, 0], sizes = [1, 256], strides = [1, 1]} : vector<9x256xf32> to vector<1x256xf32>
    %47 = vector.broadcast %46 : vector<1x256xf32> to vector<16x256xf32>
    %48 = arith.mulf %45, %47 : vector<16x256xf32>
    %49 = arith.addf %44, %48 : vector<16x256xf32>
    %50 = vector.extract_strided_slice %23 {offsets = [1, 32], sizes = [16, 256], strides = [1, 1]} : vector<18x384xf32> to vector<16x256xf32>
    %51 = vector.extract_strided_slice %14 {offsets = [5, 0], sizes = [1, 256], strides = [1, 1]} : vector<9x256xf32> to vector<1x256xf32>
    %52 = vector.broadcast %51 : vector<1x256xf32> to vector<16x256xf32>
    %53 = arith.mulf %50, %52 : vector<16x256xf32>
    %54 = arith.addf %49, %53 : vector<16x256xf32>
    %55 = vector.extract_strided_slice %23 {offsets = [2, 0], sizes = [16, 256], strides = [1, 1]} : vector<18x384xf32> to vector<16x256xf32>
    %56 = vector.extract_strided_slice %14 {offsets = [6, 0], sizes = [1, 256], strides = [1, 1]} : vector<9x256xf32> to vector<1x256xf32>
    %57 = vector.broadcast %56 : vector<1x256xf32> to vector<16x256xf32>
    %58 = arith.mulf %55, %57 : vector<16x256xf32>
    %59 = arith.addf %54, %58 : vector<16x256xf32>
    %60 = vector.extract_strided_slice %23 {offsets = [2, 16], sizes = [16, 256], strides = [1, 1]} : vector<18x384xf32> to vector<16x256xf32>
    %61 = vector.extract_strided_slice %14 {offsets = [7, 0], sizes = [1, 256], strides = [1, 1]} : vector<9x256xf32> to vector<1x256xf32>
    %62 = vector.broadcast %61 : vector<1x256xf32> to vector<16x256xf32>
    %63 = arith.mulf %60, %62 : vector<16x256xf32>
    %64 = arith.addf %59, %63 : vector<16x256xf32>
    %65 = vector.extract_strided_slice %23 {offsets = [2, 32], sizes = [16, 256], strides = [1, 1]} : vector<18x384xf32> to vector<16x256xf32>
    %66 = vector.extract_strided_slice %14 {offsets = [8, 0], sizes = [1, 256], strides = [1, 1]} : vector<9x256xf32> to vector<1x256xf32>
    %67 = vector.broadcast %66 : vector<1x256xf32> to vector<16x256xf32>
    %68 = arith.mulf %65, %67 : vector<16x256xf32>
    %69 = arith.addf %64, %68 : vector<16x256xf32>
    %70 = vector.broadcast %15 : vector<1x256xf32> to vector<16x256xf32>
    %71 = arith.addf %69, %70 : vector<16x256xf32>
    %72 = arith.negf %71 : vector<16x256xf32>
    %73 = math.exp %72 : vector<16x256xf32>
    %cst_13 = arith.constant 1.000000e+00 : f32
    %74 = vector.broadcast %cst_13 : f32 to vector<16x256xf32>
    %75 = arith.addf %74, %73 : vector<16x256xf32>
    %76 = arith.divf %74, %75 : vector<16x256xf32>
    %77 = arith.mulf %71, %76 : vector<16x256xf32>
    %cst_14 = arith.constant dense<0.000000e+00> : vector<256xf32>
    %78 = vector.multi_reduction <add>, %77, %cst_14 [0] : vector<16x256xf32> to vector<256xf32>
    %79 = vector.shape_cast %78 : vector<256xf32> to vector<1x256xf32>
    %80 = arith.truncf %79 : vector<1x256xf32> to vector<1x256xbf16>
    %c0_15 = arith.constant 0 : index
    %c0_16 = arith.constant 0 : index
    %81 = vector.load %arg6[%c0_15, %c0_16] : memref<256x128xbf16, #tpu.memory_space<vmem>>, vector<256x128xbf16>
    %cst_17 = arith.constant dense<0.000000e+00> : vector<1x128xf32>
    %82 = tpu.matmul %80, %81, %cst_17 {dimension_numbers = #tpu.dot_dimension_numbers<[1], [0], [0], [1], [0, 0, 1, 1], [], []>} : vector<1x256xbf16>, vector<256x128xbf16>, vector<1x128xf32> -> vector<1x128xf32>
    %c0_18 = arith.constant 0 : index
    %c0_19 = arith.constant 0 : index
    %83 = vector.load %arg7[%c0_18, %c0_19] : memref<1x128xf32, #tpu.memory_space<vmem>>, vector<1x128xf32>
    %84 = arith.addf %82, %83 : vector<1x128xf32>
    %85 = arith.negf %84 : vector<1x128xf32>
    %86 = math.exp %85 : vector<1x128xf32>
    %cst_20 = arith.constant 1.000000e+00 : f32
    %87 = vector.broadcast %cst_20 : f32 to vector<1x128xf32>
    %88 = arith.addf %87, %86 : vector<1x128xf32>
    %89 = arith.divf %87, %88 : vector<1x128xf32>
    %90 = arith.mulf %84, %89 : vector<1x128xf32>
    %91 = arith.truncf %90 : vector<1x128xf32> to vector<1x128xbf16>
    %c0_21 = arith.constant 0 : index
    %c0_22 = arith.constant 0 : index
    %92 = vector.load %arg8[%c0_21, %c0_22] : memref<128x256xbf16, #tpu.memory_space<vmem>>, vector<128x256xbf16>
    %cst_23 = arith.constant dense<0.000000e+00> : vector<1x256xf32>
    %93 = tpu.matmul %91, %92, %cst_23 {dimension_numbers = #tpu.dot_dimension_numbers<[1], [0], [0], [1], [0, 0, 1, 1], [], []>} : vector<1x128xbf16>, vector<128x256xbf16>, vector<1x256xf32> -> vector<1x256xf32>
    %c0_24 = arith.constant 0 : index
    %c0_25 = arith.constant 0 : index
    %94 = vector.load %arg9[%c0_24, %c0_25] : memref<1x256xf32, #tpu.memory_space<vmem>>, vector<1x256xf32>
    %95 = arith.addf %93, %94 : vector<1x256xf32>
    %96 = arith.negf %95 : vector<1x256xf32>
    %97 = math.exp %96 : vector<1x256xf32>
    %cst_26 = arith.constant 1.000000e+00 : f32
    %98 = vector.broadcast %cst_26 : f32 to vector<1x256xf32>
    %99 = arith.addf %98, %97 : vector<1x256xf32>
    %100 = arith.divf %98, %99 : vector<1x256xf32>
    %101 = vector.broadcast %100 : vector<1x256xf32> to vector<16x256xf32>
    %102 = arith.mulf %77, %101 : vector<16x256xf32>
    %103 = arith.truncf %102 : vector<16x256xf32> to vector<16x256xbf16>
    %c0_27 = arith.constant 0 : index
    %c0_28 = arith.constant 0 : index
    %104 = vector.load %arg10[%c0_27, %c0_28] : memref<256x128xbf16, #tpu.memory_space<vmem>>, vector<256x128xbf16>
    %cst_29 = arith.constant dense<0.000000e+00> : vector<16x128xf32>
    %105 = tpu.matmul %103, %104, %cst_29 {dimension_numbers = #tpu.dot_dimension_numbers<[1], [0], [0], [1], [0, 0, 1, 1], [], []>} : vector<16x256xbf16>, vector<256x128xbf16>, vector<16x128xf32> -> vector<16x128xf32>
    %c0_30 = arith.constant 0 : index
    %c0_31 = arith.constant 0 : index
    %106 = vector.load %arg11[%c0_30, %c0_31] : memref<1x128xf32, #tpu.memory_space<vmem>>, vector<1x128xf32>
    %107 = vector.broadcast %106 : vector<1x128xf32> to vector<16x128xf32>
    %108 = arith.addf %105, %107 : vector<16x128xf32>
    %109 = vector.extract_strided_slice %1 {offsets = [1, 0], sizes = [16, 128], strides = [1, 1]} : vector<18x128xf32> to vector<16x128xf32>
    %110 = arith.addf %108, %109 : vector<16x128xf32>
    %111 = vector.shape_cast %110 : vector<16x128xf32> to vector<1x16x128xf32>
    %c0_32 = arith.constant 0 : index
    %c0_33 = arith.constant 0 : index
    %c0_34 = arith.constant 0 : index
    %112 = vector.load %arg12[%c0_32, %c0_33, %c0_34] : memref<1x16x128xf32, #tpu.memory_space<vmem>>, vector<1x16x128xf32>
    tpu.vector_store %arg12[%c0_32, %c0_33, %c0_34], %111 {strides = array<i32>} : memref<1x16x128xf32, #tpu.memory_space<vmem>>, vector<1x16x128xf32>,
    return
  }
  func.func @transform_0(%arg0: i32) -> (i32, i32, i32) {
    %c0_i32 = arith.constant 0 : i32
    %c0_i32_0 = arith.constant 0 : i32
    %c0_i32_1 = arith.constant 0 : i32
    return %arg0, %c0_i32, %c0_i32_0 : i32, i32, i32
  }
  func.func @transform_1(%arg0: i32) -> (i32, i32) {
    %c0_i32 = arith.constant 0 : i32
    %c0_i32_0 = arith.constant 0 : i32
    %c0_i32_1 = arith.constant 0 : i32
    return %c0_i32, %c0_i32_0 : i32, i32
  }
  func.func @transform_2(%arg0: i32) -> (i32, i32) {
    %c0_i32 = arith.constant 0 : i32
    %c0_i32_0 = arith.constant 0 : i32
    %c0_i32_1 = arith.constant 0 : i32
    return %c0_i32, %c0_i32_0 : i32, i32
  }
  func.func @transform_3(%arg0: i32) -> (i32, i32) {
    %c0_i32 = arith.constant 0 : i32
    %c0_i32_0 = arith.constant 0 : i32
    %c0_i32_1 = arith.constant 0 : i32
    return %c0_i32, %c0_i32_0 : i32, i32
  }
  func.func @transform_4(%arg0: i32) -> (i32, i32) {
    %c0_i32 = arith.constant 0 : i32
    %c0_i32_0 = arith.constant 0 : i32
    %c0_i32_1 = arith.constant 0 : i32
    return %c0_i32, %c0_i32_0 : i32, i32
  }
  func.func @transform_5(%arg0: i32) -> (i32, i32) {
    %c0_i32 = arith.constant 0 : i32
    %c0_i32_0 = arith.constant 0 : i32
    %c0_i32_1 = arith.constant 0 : i32
    return %c0_i32, %c0_i32_0 : i32, i32
  }
  func.func @transform_6(%arg0: i32) -> (i32, i32) {
    %c0_i32 = arith.constant 0 : i32
    %c0_i32_0 = arith.constant 0 : i32
    %c0_i32_1 = arith.constant 0 : i32
    return %c0_i32, %c0_i32_0 : i32, i32
  }
  func.func @transform_7(%arg0: i32) -> (i32, i32) {
    %c0_i32 = arith.constant 0 : i32
    %c0_i32_0 = arith.constant 0 : i32
    %c0_i32_1 = arith.constant 0 : i32
    return %c0_i32, %c0_i32_0 : i32, i32
  }
  func.func @transform_8(%arg0: i32) -> (i32, i32) {
    %c0_i32 = arith.constant 0 : i32
    %c0_i32_0 = arith.constant 0 : i32
    %c0_i32_1 = arith.constant 0 : i32
    return %c0_i32, %c0_i32_0 : i32, i32
  }
  func.func @transform_9(%arg0: i32) -> (i32, i32) {
    %c0_i32 = arith.constant 0 : i32
    %c0_i32_0 = arith.constant 0 : i32
    %c0_i32_1 = arith.constant 0 : i32
    return %c0_i32, %c0_i32_0 : i32, i32
  }
  func.func @transform_10(%arg0: i32) -> (i32, i32) {
    %c0_i32 = arith.constant 0 : i32
    %c0_i32_0 = arith.constant 0 : i32
    %c0_i32_1 = arith.constant 0 : i32
    return %c0_i32, %c0_i32_0 : i32, i32
  }
  func.func @transform_11(%arg0: i32) -> (i32, i32, i32) {
    %c0_i32 = arith.constant 0 : i32
    %c0_i32_0 = arith.constant 0 : i32
    %c0_i32_1 = arith.constant 0 : i32
    return %arg0, %c0_i32, %c0_i32_0 : i32, i32, i32
  }
}

</mosaic_0001>

<bundles_post_ra>
// kernel: tpu_custom_call.1
= control target key start
LH: loop header
LB: loop body
LE: loop exit
PB: predicated region body
PF: predicated region fallthrough
CT: control target
= control target key end

     0   :  { %s3547_s0 = inlined_call_operand.vmem [shape: f32[2,18,128], index: 0, kind: input, shape index: {}]   ;;  %s3548_s1 = inlined_call_operand.hbm [shape: bf16[128,384], index: 1, kind: input, shape index: {}]   ;;  %s3549_s2 = inlined_call_operand.vmem [shape: f32[1,384], index: 2, kind: input, shape index: {}]   ;;  %s3550_s3 = inlined_call_operand.vmem [shape: f32[9,256], index: 3, kind: input, shape index: {}]   ;;  %s3551_s4 = inlined_call_operand.vmem [shape: f32[1,256], index: 4, kind: input, shape index: {}]   ;;  %s3552_s5 = inlined_call_operand.hbm [shape: bf16[256,128], index: 5, kind: input, shape index: {}]   ;;  %s3553_s6 = inlined_call_operand.vmem [shape: f32[1,128], index: 6, kind: input, shape index: {}]   ;;  %s3554_s7 = inlined_call_operand.hbm [shape: bf16[128,256], index: 7, kind: input, shape index: {}]   ;;  %s3555_s8 = inlined_call_operand.vmem [shape: f32[1,256], index: 8, kind: input, shape index: {}]   ;;  %s3556_s9 = inlined_call_operand.hbm [shape: bf16[256,128], index: 9, kind: input, shape index: {}]   ;;  %s3557_s10 = inlined_call_operand.vmem [shape: f32[1,128], index: 10, kind: input, shape index: {}]   ;;  %s3558_s11 = inlined_call_operand.hbm [shape: f32[2,16,128], index: 11, kind: output, shape index: {}]  }
   0x1   :  { %3570 = sst [smem:[#allocation21_spill]] %s3552_s5 }
   0x2   :  { %16 = vsyncpa [#allocation3], 0 }
   0x3   :  { %17 = vsyncpa [#allocation6], 0 }
   0x4   :  { %18 = vsyncpa [#allocation9], 0 }
   0x5   :  { %19 = vsyncpa [#allocation4], 0 }
   0x6   :  { %21 = vsyncpa [#allocation4 + $0x1], 0  ;;  %s2740_s17 = smov 0   ;;  %s2742_s18 = smov 0  }
   0x7   :  { %s2744_s19 = smov 0   ;;  %s2746_s20 = smov 0  }
   0x8 LB: > { %3571 = sst [smem:[#allocation15_spill]] %s2648_s17  ;;  %s2761_s21 = sadd.s32 4294967295, %s2660_s20   ;;  %s2660_s20 = sphi %s2746_s20, %s3597_s20   ;;  %s2656_s19 = sphi %s2744_s19, %s3599_s19   ;;  %s2652_s18 = sphi %s2742_s18, %s3601_s18   ;;  %s2648_s17 = sphi %s2740_s17, %s3600_s17  }
   0x9   : > { %3572 = sst [smem:[#allocation16_spill]] %s2656_s19  ;;  %s2040_s22 = sadd.s32 4294967294, %s2660_s20  }
   0xa   : > { %3573 = sst [smem:[#allocation17_spill]] %s2660_s20  ;;  %s2765_s23 = sadd.s32 1, %s2660_s20  }
   0xb   : > { %3574 = sst [smem:[#allocation18_spill]] %s2765_s23  ;;  %s270_s24 = sadd.s32 1, %s2656_s19 }
   0xc   : > { %s267_s25 = ssub.s32 %s2660_s20, %s2765_s23  ;;  %p280_p0 = scmp.ne.s32.totalorder %s2656_s19, %s2652_s18 }
   0xd   : > { %p268_p1 = scmp.eq.s32.totalorder %s267_s25, 0  ;;  %p281_p2 = scmp.eq.s32.totalorder %s2761_s21, 1 }
   0xe   : > { %p286_p3 = scmp.ne.s32.totalorder %s2652_s18, %s2648_s17  ;;  %p287_p4 = scmp.eq.s32.totalorder %s2040_s22, 1 }
   0xf   : > { %s2776_s26 = scalar_select %p268_p1, %s2656_s19, %s270_s24  }
  0x10   : > { %p2778_p5 = por %p281_p2, %p280_p0  ;;  %p2782_p6 = por %p287_p4, %p286_p3 }
  0x11   : > { %3575 = sst [smem:[#allocation19_spill]] %s2776_s26  ;;  %p2041_p7 = scmp.ge.s32.totalorder %s2660_s20, 1 }
  0x12   : > { %s3576_s27 = scalar_select %p2778_p5, 1, 0 }
  0x13   : > { %s3577_s28 = scalar_select %p2782_p6, 1, 0 }
  0x14   : > { %p294_p8 = scmp.lt.s32.totalorder %s2660_s20, 3  ;;  %p3560_p9 = scmp.eq.s32.totalorder %s2761_s21, 0 }
  0x15   : > { %3578 = sst [smem:[#allocation20_spill]] %s3577_s28  ;;  %s2662_s30 = smov [#allocation5]  }
  0x16   : > { %p2789_p10 = pnand %p2041_p7, %p294_p8  ;;  %s328_s12 = sshll.u32 %s2662_s30, 4  ;;  %s329_s12 = int_to_ptr.vmem [resolvable:$true] %s328_s12 }
  0x17   : > { %s2663_s14 = smov [#allocation2]   ;;  %s3581_s5 = sld [smem:[#allocation21_spill]] }
  0x18   : > { %s3579_s29 = scalar_select %p2789_p10, 1, 0 }
  0x19   : > { %p2244_p11 = pneg %p2789_p10  ;;  %s306_s15 = sshll.u32 %s2663_s14, 4  ;;  %s2801_s15 = int_to_ptr.vmem [resolvable:$true] %s306_s15 }
  0x1b   : > { %p2797_p12 = pnand %p3560_p9, %p2244_p11 }
  0x1d   : > { %s2474_s24 = scalar_lea.hbm %s3581_s5, 2048  ;;  %p2811_p0 = pneg %p2797_p12 }
  0x1e   : > { %p2475_p13 = scmp.ne.s32.totalorder %s3581_s5, %s2474_s24  ;;  %p2481_p3 = scmp.lt.u32.totalorder %s2474_s24, %s3581_s5 }
  0x20   : > { %p2477_p1 = pnand %p2811_p0, %p2475_p13 }
  0x22   : > { %p2478_p2 = pneg %p2477_p1 }
  0x24   : > { %p2483_p4 = pnand %p2481_p3, %p2478_p2 }
  0x26   : > { %2486 = shalt.err (!%p2483_p4)
}
  0x27   : > { %s2487_s16 = scalar_lea.vmem %s329_s12, 2048  ;;  %p2495_p9 = scmp.lt.s32.totalorder %s329_s12, %s329_s12 }
  0x28   : > { %p2488_p7 = scmp.ne.s32.totalorder %s329_s12, %s2487_s16  ;;  %p2496_p6 = scmp.lt.s32.totalorder %s2487_s16, %s2487_s16 }
  0x2a   : > { %p2490_p8 = pnand %p2488_p7, %p2811_p0  ;;  %p2497_p5 = por %p2496_p6, %p2495_p9 }
  0x2c   : > { %p2491_p11 = pneg %p2490_p8 }
  0x2e   : > { %p2498_p10 = pnand %p2497_p5, %p2491_p11 }
  0x30   : > { %2501 = shalt.err (!%p2498_p10)
}
  0x31   : > { %s3568_s26 = smov 64   ;;  %s3569_s22 = smov 4  }
  0x32   : > { %2250 = dma.hbm_to_vmem [thread:$0]  (!%p2797_p12), %s3581_s5, 2048, %s329_s12, [#allocation6], %s3568_s26, %s3568_s26, %s3569_s22  }
  0x33   : > { %s2502_s23 = scalar_lea.hbm %s3548_s1, 3072 }
  0x34   : > { %p2503_p5 = scmp.ne.s32.totalorder %s3548_s1, %s2502_s23  ;;  %p2509_p10 = scmp.lt.u32.totalorder %s2502_s23, %s3548_s1 }
  0x36   : > { %p2505_p6 = pnand %p2503_p5, %p2811_p0 }
  0x38   : > { %p2506_p9 = pneg %p2505_p6 }
  0x3a   : > { %p2511_p13 = pnand %p2509_p10, %p2506_p9 }
  0x3c   : > { %2514 = shalt.err (!%p2511_p13)
}
  0x3d   : > { %s2515_s12 = scalar_lea.vmem %s2801_s15, 3072  ;;  %p2523_p4 = scmp.lt.s32.totalorder %s2801_s15, %s2801_s15 }
  0x3e   : > { %p2516_p1 = scmp.ne.s32.totalorder %s2801_s15, %s2515_s12  ;;  %p2524_p7 = scmp.lt.s32.totalorder %s2515_s12, %s2515_s12 }
  0x40   : > { %p2518_p2 = pnand %p2516_p1, %p2811_p0  ;;  %p2525_p8 = por %p2524_p7, %p2523_p4 }
  0x42   : > { %p2519_p3 = pneg %p2518_p2 }
  0x44   : > { %p2526_p11 = pnand %p2525_p8, %p2519_p3 }
  0x46   : > { %2529 = shalt.err (!%p2526_p11)
}
  0x47   : > { %s2666_s28 = smov 192   ;;  %s2667_s17 = smov 12  }
  0x48   : > { %2247 = dma.hbm_to_vmem [thread:$0]  (!%p2797_p12), %s3548_s1, 3072, %s2801_s15, [#allocation3], %s2666_s28, %s2666_s28, %s2667_s17  }
  0x49   : > { %s2668_s19 = smov [#allocation7]   ;;  %s2530_s16 = scalar_lea.hbm %s3554_s7, 2048 }
  0x4a   : > { %s344_s24 = sshll.u32 %s2668_s19, 4  ;;  %p2531_p5 = scmp.ne.s32.totalorder %s3554_s7, %s2530_s16  ;;  %s345_s24 = int_to_ptr.vmem [resolvable:$true] %s344_s24 }
  0x4b   : > { %p2537_p10 = scmp.lt.u32.totalorder %s2530_s16, %s3554_s7 }
  0x4c   : > { %p2533_p6 = pnand %p2531_p5, %p2811_p0 }
  0x4e   : > { %p2534_p9 = pneg %p2533_p6 }
  0x50   : > { %p2539_p13 = pnand %p2537_p10, %p2534_p9 }
  0x52   : > { %2542 = shalt.err (!%p2539_p13)
}
  0x53   : > { %s2543_s15 = scalar_lea.vmem %s345_s24, 2048  ;;  %p2551_p4 = scmp.lt.s32.totalorder %s345_s24, %s345_s24 }
  0x54   : > { %p2544_p1 = scmp.ne.s32.totalorder %s345_s24, %s2543_s15  ;;  %p2552_p7 = scmp.lt.s32.totalorder %s2543_s15, %s2543_s15 }
  0x56   : > { %p2546_p2 = pnand %p2544_p1, %p2811_p0  ;;  %p2553_p8 = por %p2552_p7, %p2551_p4 }
  0x58   : > { %p2547_p3 = pneg %p2546_p2 }
  0x5a   : > { %p2554_p11 = pnand %p2553_p8, %p2547_p3 }
  0x5c   : > { %2557 = shalt.err (!%p2554_p11)
}
  0x5d   : > { %s2669_s26 = smov 128   ;;  %s2670_s28 = smov 8  }
  0x5e   : > { %2253 = dma.hbm_to_vmem [thread:$0]  (!%p2797_p12), %s3554_s7, 2048, %s345_s24, [#allocation6], %s2669_s26, %s2669_s26, %s2670_s28  }
  0x5f   : > { %s2671_s17 = smov [#allocation8]   ;;  %s2558_s25 = scalar_lea.hbm %s3556_s9, 2048 }
  0x60   : > { %s360_s20 = sshll.u32 %s2671_s17, 4  ;;  %p2559_p5 = scmp.ne.s32.totalorder %s3556_s9, %s2558_s25  ;;  %s361_s20 = int_to_ptr.vmem [resolvable:$true] %s360_s20 }
  0x61   : > { %p2565_p10 = scmp.lt.u32.totalorder %s2558_s25, %s3556_s9 }
  0x62   : > { %p2561_p6 = pnand %p2559_p5, %p2811_p0 }
  0x64   : > { %p2562_p9 = pneg %p2561_p6 }
  0x66   : > { %p2567_p13 = pnand %p2565_p10, %p2562_p9 }
  0x68   : > { %2570 = shalt.err (!%p2567_p13)
}
  0x69   : > { %s2571_s24 = scalar_lea.vmem %s361_s20, 2048  ;;  %p2579_p4 = scmp.lt.s32.totalorder %s361_s20, %s361_s20 }
  0x6a   : > { %p2572_p1 = scmp.ne.s32.totalorder %s361_s20, %s2571_s24  ;;  %p2580_p7 = scmp.lt.s32.totalorder %s2571_s24, %s2571_s24 }
  0x6c   : > { %p2574_p2 = pnand %p2572_p1, %p2811_p0  ;;  %p2581_p8 = por %p2580_p7, %p2579_p4 }
  0x6e   : > { %p2575_p3 = pneg %p2574_p2 }
  0x70   : > { %p2582_p11 = pnand %p2581_p8, %p2575_p3 }
  0x72   : > { %2585 = shalt.err (!%p2582_p11)
}
  0x73   : > { %s3583_s26 = smov 4   ;;  %s3584_s28 = smov 64  }
  0x74   : > { %2256 = dma.hbm_to_vmem [thread:$0]  (!%p2797_p12), %s3556_s9, 2048, %s361_s20, [#allocation9], %s3584_s28, %s3584_s28, %s3583_s26  }
  0x75   : > { %p3585_p5 = scmp.ne.s32.totalorder %s3579_s29, 0 }
  0x76   : > { %p3586_p0 = scmp.eq.s32.totalorder (!%p3585_p5), %s2761_s21, 0 }
  0x77   : > { %387 = sbr.rel (%p3585_p5) target bundleno = 1378 (0x562), region = 64 }
  0x7e   : > { %2631 = dma.done.wait (%p3586_p0), [#allocation3], 3072   ;;  %p3587_p6 = pmov %p3586_p0 }
  0x7f   : > { %p3588_p9 = pmov %p3586_p0 }
  0x80   : > { %2633 = vsyncadd (%p3587_p6), [#allocation3], 4294964224 }
  0x81   : > { %2635 = dma.done.wait (%p3588_p9), [#allocation6], 4096   ;;  %p3589_p10 = pmov %p3586_p0 }
  0x82   : > { %p3590_p13 = pmov %p3586_p0 }
  0x83   : > { %2637 = vsyncadd (%p3589_p10), [#allocation6], 4294963200 }
  0x84   : > { %2639 = dma.done.wait (%p3590_p13), [#allocation9], 2048   ;;  %p3591_p12 = pmov %p3586_p0 }
  0x85   : > { %v2672_v0 = vmov 0   ;;  %v2319_v1 = vld [vmem:[#allocation2 + $0x4] ss:$12 sps:$4 sm:$0xff]   ;;  %v2321_v2 = vld [vmem:[#allocation2 + $0x8] ss:$12 sps:$4 sm:$0xff]   ;;  %p439_p1 = scmp.lt.s32.totalorder %s2761_s21, 1  ;;  %v484_v11 = vlaneseq }
  0x86   : > { %2641 = vsyncadd (%p3591_p12), [#allocation9], 4294965248  ;;  %659 = vmatprep.mubr.bf16.mxu0 %v2672_v0  ;;  %627 = vmatprep.subr.bf16.mxu0 %v2319_v1  ;;  %v2322_v3 = vld [vmem:[#allocation2] ss:$12 sps:$4 sm:$0xff]   ;;  %v2323_v4 = vld [vmem:[#allocation2 + $0x1c] ss:$12 sps:$4 sm:$0xff]  }
  0x87   : > { %2205 = vmatprep.subr.bf16.mxu1 %v2321_v2  ;;  %628 = vmatpush1.bf16.msra.mxu0 %v2322_v3  ;;  %v2325_v5 = vld [vmem:[#allocation2 + $0x20] ss:$12 sps:$4 sm:$0xff]   ;;  %v2326_v6 = vld [vmem:[#allocation2 + $0x18] ss:$12 sps:$4 sm:$0xff]   ;;  %v2330_v9 = vld [vmem:[#allocation2 + $0x30] ss:$12 sps:$4 sm:$0xff]  }
  0x88   : > { %2206 = vmatpush3.bf16.msra.mxu1 %v2321_v2  ;;  %629 = vmatprep.subr.bf16.mxu0 %v2323_v4  ;;  %v2327_v7 = vld [vmem:[#allocation2 + $0x34] ss:$12 sps:$4 sm:$0xff]   ;;  %v2329_v8 = vld [vmem:[#allocation2 + $0x38] ss:$12 sps:$4 sm:$0xff]   ;;  %s440_s29 = scalar_select %p439_p1, %s2761_s21, 1  ;;  %v2909_v14 = vshrl.u32 %v484_v11, 7 }
  0x89   : > { %2207 = vmatprep.subr.bf16.mxu1 %v2325_v5  ;;  %v2331_v10 = vld [vmem:[#allocation2 + $0x4c] ss:$12 sps:$4 sm:$0xff]   ;;  %v2333_v12 = vld [vmem:[#allocation2 + $0x50] ss:$12 sps:$4 sm:$0xff]   ;;  %v2334_v13 = vld [vmem:[#allocation2 + $0x48] ss:$12 sps:$4 sm:$0xff]  }
  0x8a   : > { %s2225_s13 = smul.u32 24, %s440_s29  ;;  %v2335_v15 = vld [vmem:[#allocation2 + $0x64] ss:$12 sps:$4 sm:$0xff]   ;;  %v2337_v16 = vld [vmem:[#allocation2 + $0x68] ss:$12 sps:$4 sm:$0xff]   ;;  %v2917_v19 = vsub.s32 2, %v2909_v14 }
  0x8b   : > { %630 = vmatpush1.bf16.msra.mxu0 %v2326_v6  ;;  %v2338_v17 = vld [vmem:[#allocation2 + $0x60] ss:$12 sps:$4 sm:$0xff]   ;;  %v2339_v18 = vld [vmem:[#allocation2 + $0x7c] ss:$12 sps:$4 sm:$0xff]   ;;  %v2920_v20 = vsub.s32 1, %v2909_v14  ;;  %v2927_v24 = vld [vmem:[%s3550_s3] sm:$0xff] }
  0x8c   : > { %2208 = vmatpush3.bf16.msra.mxu1 %v2325_v5  ;;  %631 = vmatprep.subr.bf16.mxu0 %v2327_v7  ;;  %s2914_s20 = scalar_lea.vmem %s3547_s0, %s2225_s13  ;;  %v2341_v21 = vld [vmem:[#allocation2 + $0x80] ss:$12 sps:$4 sm:$0xff]   ;;  %v2342_v25 = vld [vmem:[#allocation2 + $0x78] ss:$12 sps:$4 sm:$0xff]   ;;  %v985_v28 = vsub.s32 4, %v2909_v14  ;;  %v1060_v29 = vsub.s32 5, %v2909_v14  ;;  %v891_v32 = vrot.slane %v2927_v24, %v2917_v19 }
  0x8d   : > { %2209 = vmatprep.subr.bf16.mxu1 %v2329_v8  ;;  %v445_v22 = vld [vmem:[%s2914_s20] sm:$0xff]  ;;  %v446_v23 = vld [vmem:[%s2914_s20 + $0x8] sm:$0xff]  ;;  %v835_v33 = vrot.slane %v2927_v24, %v2920_v20  ;;  %s2673_s16 = smov 32   ;;  %s2674_s12 = smov 16   ;;  %v447_v40 = vld [vmem:[%s2914_s20 + $0x10] sm:$0x3] }
  0x8e   : > { %v448_v26 = vpack.c.bf16 %v446_v23, %v445_v22  ;;  %v2932_v27 = vld [vmem:[%s3550_s3 + $0x8] sm:$0xff]  ;;  %v2343_v30 = vld [vmem:[#allocation2 + $0x94] ss:$12 sps:$4 sm:$0xff]   ;;  %898 = vrot.lane.b32.xlu1 %v891_v32, %s2673_s16  ;;  %v986_v42 = vrot.slane %v2927_v24, %v985_v28  ;;  %v449_v43 = vpack.c.bf16 %v447_v40, %v447_v40  ;;  %v1174_v45 = vsub.s32 7, %v2909_v14  ;;  %v2088_v49 = vld [vmem:[%s3550_s3 + $0x18] ss:$0 sm:$0xff] }
  0x8f   : > { %632 = vmatpush1.bf16.msra.mxu0 %v2330_v9  ;;  %v2345_v31 = vld [vmem:[#allocation2 + $0x98] ss:$12 sps:$4 sm:$0xff]   ;;  %v2346_v34 = vld [vmem:[#allocation2 + $0x90] ss:$12 sps:$4 sm:$0xff]   ;;  %842 = vrot.lane.b32.xlu0 %v835_v33, %s2674_s12  ;;  %v895_v37 = vrot.slane %v2932_v27, %v2917_v19  ;;  %v839_v38 = vrot.slane %v2932_v27, %v2920_v20  ;;  %v2350_v39 = vld [vmem:[#allocation2 + $0xa8] ss:$12 sps:$4 sm:$0xff]   ;;  %v990_v41 = vrot.slane %v2932_v27, %v985_v28 }
  0x90   : > { %2210 = vmatpush3.bf16.msra.mxu1 %v2329_v8  ;;  %633 = vmatprep.subr.bf16.mxu0 %v2331_v10  ;;  %v2347_v35 = vld [vmem:[#allocation2 + $0xac] ss:$12 sps:$4 sm:$0xff]   ;;  %v2349_v36 = vld [vmem:[#allocation2 + $0xb0] ss:$12 sps:$4 sm:$0xff]   ;;  %v1065_v44 = vrot.slane %v2932_v27, %v1060_v29  ;;  %v1061_v46 = vrot.slane %v2927_v24, %v1060_v29  ;;  %v1179_v47 = vrot.slane %v2932_v27, %v1174_v45  ;;  %v2087_v50 = vld [vmem:[%s3550_s3 + $0x10] ss:$0 sm:$0xff] }
  0x91   : > { %2211 = vmatprep.subr.bf16.mxu1 %v2333_v12  ;;  %2221 = vmatprep.mubr.bf16.mxu1 %v448_v26  ;;  %v1175_v48 = vrot.slane %v2927_v24, %v1174_v45  ;;  %v2973_v51 = vsub.s32 0, %v2909_v14  ;;  %v482_v54 = vld [vmem:[%s3549_s2] sm:$0x7]  ;;  %vm902_vm0 = vcmask 261120   ;;  %vm846_vm1 = vcmask 130048   ;;  %s2675_s29 = smov 112  }
  0x92   : > { %900 = vrot.lane.b32.xlu1 %v895_v37, %s2673_s16  ;;  %v495_v56 = vrot.slane %v482_v54, %v2917_v19  ;;  %v491_v57 = vrot.slane %v482_v54, %v2920_v20  ;;  %vm798_vm2 = vcmp.ge.s32.totalorder %v2909_v14, 1  ;;  %vm964_vm4 = vcmask 1046528   ;;  %s2676_s13 = smov 96   ;;  %s2150_s28 = sshll.u32 %s2761_s21, 8 }
  0x93   : > { %634 = vmatpush1.bf16.msra.mxu0 %v2334_v13  ;;  %844 = vrot.lane.b32.xlu0 %v839_v38, %s2674_s12  ;;  %v487_v55 = vrot.slane %v482_v54, %v2973_v51  ;;  %vm1153_vm5 = vcmask 1045504   ;;  %vm875_vm6 = vcmask 916480   ;;  %vm931_vm7 = vcmask 785408   ;;  %p3592_p3 = scmp.ne.s32.totalorder %s3576_s27, 0  ;;  %s2677_s21 = smov [#allocation10]  }
  0x94   : > { %2212 = vmatpush3.bf16.msra.mxu1 %v2333_v12  ;;  %635 = vmatprep.subr.bf16.mxu0 %v2335_v15  ;;  %s2590_s17 = sshll.u32 %s2677_s21, 4  ;;  %s2591_s17 = int_to_ptr.vmem [resolvable:$false] %s2590_s17 }
  0x95   : > { %2213 = vmatprep.subr.bf16.mxu1 %v2337_v16  ;;  %s2592_s23 = scalar_lea.vmem %s2591_s17, 512 }
  0x96   : > { %995 = vrot.lane.b32.xlu1 %v990_v41, %s2674_s12 }
  0x97   : > { %636 = vmatpush1.bf16.msra.mxu0 %v2338_v17  ;;  %993 = vrot.lane.b32.xlu0 %v986_v42, %s2674_s12 }
  0x98   : > { %2214 = vmatpush3.bf16.msra.mxu1 %v2337_v16  ;;  %637 = vmatprep.subr.bf16.mxu0 %v2339_v18 }
  0x99   : > { %2215 = vmatprep.subr.bf16.mxu1 %v2341_v21 }
  0x9a   : > { %1070 = vrot.lane.b32.xlu1 %v1065_v44, %s2673_s16 }
  0x9b   : > { %638 = vmatpush1.bf16.msra.mxu0 %v2342_v25  ;;  %1068 = vrot.lane.b32.xlu0 %v1061_v46, %s2673_s16 }
  0x9c   : > { %2216 = vmatpush3.bf16.msra.mxu1 %v2341_v21  ;;  %639 = vmatprep.subr.bf16.mxu0 %v2343_v30 }
  0x9d   : > { %2217 = vmatprep.subr.bf16.mxu1 %v2345_v31 }
  0x9e   : > { %1184 = vrot.lane.b32.xlu1 %v1179_v47, %s2674_s12 }
  0x9f   : > { %640 = vmatpush1.bf16.msra.mxu0 %v2346_v34  ;;  %1182 = vrot.lane.b32.xlu0 %v1175_v48, %s2674_s12 }
  0xa0   : > { %2218 = vmatpush3.bf16.msra.mxu1 %v2345_v31  ;;  %641 = vmatprep.subr.bf16.mxu0 %v2347_v35 }
  0xa1   : > { %2219 = vmatprep.subr.bf16.mxu1 %v2349_v36 }
  0xa2   : > { %1259 = vrot.lane.b32.xlu1 %v2088_v49, %s2673_s16 }
  0xa3   : > { %642 = vmatpush1.bf16.msra.mxu0 %v2350_v39  ;;  %1257 = vrot.lane.b32.xlu0 %v2087_v50, %s2673_s16  ;;  %s436_s16 = sand.u32 1, %s2652_s18  }
  0xa4   : > { %2220 = vmatpush3.bf16.msra.mxu1 %v2349_v36  ;;  %s2052_s12 = sshll.u32 %s436_s16, 4 }
  0xa6   : > { %660 = vmatmul.mubr.bf16.vlgmr.msra.gmra.mrb[0].mxu0 %v448_v26 }
  0xa7   : > { %2222 = vmatmul.mubr.bf16.vlgmr.msra.gmra.mrb[0].mxu1 %v449_v43  ;;  %669 = vmatprep.mubr.bf16.mxu0 %v2672_v0 }
  0xa8   : > { %1698 = vmatprep.mubr.bf16.mxu1 %v2672_v0 }
  0xae   : > { %670 = vmatmul.mubr.bf16.gmra.mrb[4].mxu0 %v449_v43 }
 0x100   : > { %v2975_v52 = vpop.permute.xlu1 %898 }
 0x101   : > { %v2977_v53 = vpop.permute.xlu0 %842 }
 0x104   : > { %v2985_v58 = vpop.permute.xlu1 %900 }
 0x105   : > { %v2987_v59 = vpop.permute.xlu0 %844 }
 0x108   : > { %v3010_v21 = vpop.permute.xlu1 %995 }
 0x109   : > { %v3014_v25 = vpop.permute.xlu0 %993 }
 0x10c   : > { %v3020_v33 = vpop.permute.xlu1 %1070 }
 0x10d   : > { %v3022_v34 = vpop.permute.xlu0 %1068 }
 0x110   : > { %v3024_v47 = vpop.permute.xlu1 %1184 }
 0x111   : > { %v3026_v48 = vpop.permute.xlu0 %1182 }
 0x179   : > { %v661_v60 = vpop.f32.mrb[0].mxu0 }
 0x17a   : > { %v2223_v61 = vpop.f32.mrb[0].mxu1  ;;  %v2989_v62 = vadd.f32 %v661_v60, %v487_v55  ;;  %v663_v0 = vpop.f32.mrb[1].mxu0  ;;  %v946_v60 = vsub.s32 3, %v2909_v14 }
 0x17b   : > { %v2991_v63 = vadd.f32 %v2223_v61, %v495_v56  ;;  %v712_v1 = vpop.f32.mrb[1].mxu1  ;;  %v2993_v2 = vadd.f32 %v663_v0, %v491_v57  ;;  %v665_v4 = vpop.f32.mrb[2].mxu0 }
 0x17c   : > { %v2995_v3 = vadd.f32 %v712_v1, %v495_v56  ;;  %v2224_v5 = vpop.f32.mrb[2].mxu1  ;;  %v2078_v6 = vmul.f32 -1.442695, %v2989_v62  ;;  %v2999_v8 = vadd.f32 %v665_v4, %v487_v55  ;;  %v667_v9 = vpop.f32.mrb[3].mxu0  ;;  %v1135_v1 = vsub.s32 6, %v2909_v14 }
 0x17d   : > { %v2086_v7 = vmul.f32 -1.442695, %v2991_v63  ;;  %v715_v10 = vpop.f32.mrb[3].mxu1  ;;  %v2079_v11 = vmul.f32 -1.442695, %v2993_v2  ;;  %v3003_v13 = vadd.f32 %v667_v9, %v491_v57  ;;  %v3032_v61 = vpop.permute.xlu1 %1259  ;;  %v3042_v5 = vsel %vm902_vm0, %v2975_v52, %v2985_v58 }
 0x17e   : > { %v2080_v12 = vmul.f32 -1.442695, %v2995_v3  ;;  %v3005_v15 = vadd.f32 %v715_v10, %v495_v56  ;;  %2407 = vpow2.f32 %v2078_v6  ;;  %v2081_v16 = vmul.f32 -1.442695, %v2999_v8  ;;  %v3034_v0 = vpop.permute.xlu0 %1257 }
 0x17f   : > { %2409 = vpow2.f32 %v2086_v7  ;;  %v2082_v17 = vmul.f32 -1.442695, %v3003_v13  ;;  %v3047_v6 = vsel %vm846_vm1, %v2977_v53, %v2987_v59  ;;  %v3053_v10 = vsel %vm846_vm1, %v3014_v25, %v3010_v21 }
 0x180   : > { %2411 = vpow2.f32 %v2079_v11  ;;  %v2083_v18 = vmul.f32 -1.442695, %v3005_v15  ;;  %v3058_v11 = vsel %vm902_vm0, %v3022_v34, %v3020_v33 }
 0x181   : > { %2413 = vpow2.f32 %v2080_v12  ;;  %v671_v19 = vpop.f32.mrb[4].mxu0  ;;  %v3063_v12 = vsel %vm846_vm1, %v3026_v48, %v3024_v47 }
 0x182   : > { %2415 = vpow2.f32 %v2081_v16  ;;  %v3012_v22 = vadd.f32 %v671_v19, %v487_v55  ;;  %v673_v23 = vpop.f32.mrb[5].mxu0  ;;  %v3029_v55 = vadd.s32 16, %v2909_v14  ;;  %v3075_v19 = vrot.slane %v2932_v27, %v946_v60 }
 0x183   : > { %2417 = vpow2.f32 %v2082_v17  ;;  %v3016_v26 = vadd.f32 %v673_v23, %v491_v57  ;;  %v675_v28 = vpop.f32.mrb[6].mxu0 }
 0x184   : > { %2419 = vpow2.f32 %v2083_v18  ;;  %v2084_v29 = vmul.f32 -1.442695, %v3012_v22  ;;  %v676_v30 = vpop.f32.mrb[7].mxu0  ;;  %vm803_vm3 = vcmp.lt.s32.totalorder %v3029_v55, 17  ;;  %v3072_v18 = vrot.slane %v2927_v24, %v946_v60 }
 0x185   : > { %v2085_v31 = vmul.f32 -1.442695, %v3016_v26  ;;  %v3086_v30 = vrot.slane %v2932_v27, %v1135_v1 }
 0x186   : > { %2421 = vpow2.f32 %v2084_v29 }
 0x187   : > { %2423 = vpow2.f32 %v2085_v31 }
 0x188   : > { %v2408_v32 = vpop.eup %2407 }
 0x189   : > { %v2410_v35 = vpop.eup %2409  ;;  %v753_v36 = vadd.f32 1.0, %v2408_v32 }
 0x18a   : > { %v2412_v37 = vpop.eup %2411  ;;  %v761_v38 = vadd.f32 1.0, %v2410_v35 }
 0x18b   : > { %v2414_v39 = vpop.eup %2413  ;;  %2425 = vrcp.f32 %v753_v36  ;;  %v754_v40 = vadd.f32 1.0, %v2412_v37 }
 0x18c   : > { %v2416_v41 = vpop.eup %2415  ;;  %2427 = vrcp.f32 %v761_v38  ;;  %v755_v42 = vadd.f32 1.0, %v2414_v39 }
 0x18d   : > { %v2418_v43 = vpop.eup %2417  ;;  %2429 = vrcp.f32 %v754_v40  ;;  %v756_v44 = vadd.f32 1.0, %v2416_v41 }
 0x18e   : > { %v2420_v45 = vpop.eup %2419  ;;  %2431 = vrcp.f32 %v755_v42  ;;  %v757_v46 = vadd.f32 1.0, %v2418_v43 }
 0x18f   : > { %2433 = vrcp.f32 %v756_v44  ;;  %v758_v49 = vadd.f32 1.0, %v2420_v45 }
 0x190   : > { %v2422_v50 = vpop.eup %2421  ;;  %2435 = vrcp.f32 %v757_v46 }
 0x191   : > { %v2424_v54 = vpop.eup %2423  ;;  %2437 = vrcp.f32 %v758_v49  ;;  %v759_v56 = vadd.f32 1.0, %v2422_v50 }
 0x192   : > { %v760_v57 = vadd.f32 1.0, %v2424_v54 }
 0x193   : > { %2439 = vrcp.f32 %v759_v56 }
 0x194   : > { %2441 = vrcp.f32 %v760_v57 }
 0x195   : > { %v2426_v4 = vpop.eup %2425 }
 0x196   : > { %v2428_v7 = vpop.eup %2427  ;;  %v780_v9 = vmul.f32 %v2426_v4, %v2989_v62  ;;  %v3069_v62 = vsel %vm902_vm0, %v3034_v0, %v3032_v61 }
 0x197   : > { %v2430_v16 = vpop.eup %2429  ;;  %v788_v17 = vmul.f32 %v2428_v7, %v2991_v63  ;;  %v3083_v63 = vrot.slane %v2927_v24, %v1135_v1 }
 0x198   : > { %v2432_v23 = vpop.eup %2431  ;;  %v3079_v28 = vsel %vm798_vm2, %v780_v9, 0.0  ;;  %v781_v29 = vmul.f32 %v2430_v16, %v2993_v2 }
 0x199   : > { %v2434_v31 = vpop.eup %2433  ;;  %v815_v32 = vsel %vm803_vm3, %v788_v17, 0.0  ;;  %v782_v35 = vmul.f32 %v2432_v23, %v2995_v3  ;;  %v907_v36 = vmul.f32 %v2975_v52, %v3079_v28  ;;  %v851_v37 = vmul.f32 %v2977_v53, %v3079_v28 }
 0x19a   : > { %v2436_v38 = vpop.eup %2435  ;;  %v3097_v2 = vsel %vm798_vm2, %v781_v29, 0.0  ;;  %v3100_v39 = vmul.f32 %v2434_v31, %v2999_v8  ;;  %v3103_v40 = vmul.f32 %v3010_v21, %v815_v32  ;;  %v3107_v3 = vmul.f32 %v3014_v25, %v3079_v28 }
 0x19b   : > { %v2438_v41 = vpop.eup %2437  ;;  %v809_v42 = vsel %vm798_vm2, %v782_v35, 0.0  ;;  %v3112_v43 = vmul.f32 %v2436_v38, %v3003_v13  ;;  %v3115_v44 = vmul.f32 %v3020_v33, %v815_v32  ;;  %v3119_v8 = vmul.f32 %v3022_v34, %v3079_v28  ;;  %863 = vrot.lane.b32.xlu0 %v851_v37, %s2675_s29 }
 0x19c   : > { %v785_v45 = vmul.f32 %v2438_v41, %v3005_v15  ;;  %v3125_v46 = vmul.f32 %v2975_v52, %v3100_v39  ;;  %v854_v14 = vmul.f32 %v2977_v53, %v3100_v39  ;;  %v909_v13 = vmul.f32 %v2985_v58, %v809_v42 }
 0x19d   : > { %v2440_v49 = vpop.eup %2439  ;;  %v853_v50 = vmul.f32 %v2987_v59, %v809_v42  ;;  %v1003_v54 = vmul.f32 %v3010_v21, %v809_v42  ;;  %v3134_v56 = vmul.f32 %v3014_v25, %v3100_v39  ;;  %v1078_v15 = vmul.f32 %v3020_v33, %v809_v42 }
 0x19e   : > { %v2442_v52 = vpop.eup %2441  ;;  %v786_v57 = vmul.f32 %v2440_v49, %v3012_v22  ;;  %v3139_v53 = vmul.f32 %v2985_v58, %v785_v45  ;;  %v3142_v60 = vmul.f32 %v2987_v59, %v785_v45  ;;  %v1006_v1 = vmul.f32 %v3010_v21, %v785_v45 }
 0x19f   : > { %v787_v4 = vmul.f32 %v2442_v52, %v3016_v26  ;;  %v1081_v7 = vmul.f32 %v3020_v33, %v785_v45  ;;  %v3149_v9 = vmul.f32 %v3022_v34, %v3100_v39  ;;  %v1192_v16 = vmul.f32 %v3024_v47, %v809_v42  ;;  %867 = vrot.lane.b32.xlu1 %v853_v50, %s2675_s29 }
 0x1a0   : > { %v3155_v58 = vsel %vm803_vm3, %v786_v57, 0.0  ;;  %v3158_v59 = vmul.f32 %v3024_v47, %v785_v45  ;;  %v3161_v21 = vmul.f32 %v3024_v47, %v815_v32  ;;  %v1190_v22 = vmul.f32 %v3026_v48, %v3079_v28  ;;  %919 = vrot.lane.b32.xlu0 %v907_v36, %s2676_s13 }
 0x1a1   : > { %v3168_v26 = vsel %vm803_vm3, %v787_v4, 0.0  ;;  %v3172_v33 = vmul.f32 %v3014_v25, %v3155_v58  ;;  %v3176_v17 = vmul.f32 %v3022_v34, %v3155_v58  ;;  %v3180_v47 = vmul.f32 %v3026_v48, %v3100_v39 }
 0x1a2   : > { %v3184_v23 = vmul.f32 %v3026_v48, %v3155_v58  ;;  %v3187_v55 = vmul.f32 %v3032_v61, %v809_v42  ;;  %v3190_v29 = vmul.f32 %v3032_v61, %v785_v45  ;;  %v3193_v25 = vmul.f32 %v3032_v61, %v815_v32 }
 0x1a3   : > { %v3197_v34 = vmul.f32 %v3034_v0, %v3079_v28  ;;  %v3201_v31 = vmul.f32 %v3034_v0, %v3100_v39  ;;  %v3205_v48 = vmul.f32 %v3034_v0, %v3155_v58  ;;  %869 = vrot.lane.b32.xlu1 %v854_v14, %s2675_s29  ;;  %v852_v35 = vmul.f32 %v3047_v6, %v3097_v2 }
 0x1a4   : > { %v908_v61 = vmul.f32 %v3042_v5, %v3097_v2  ;;  %v855_v32 = vmul.f32 %v3047_v6, %v3112_v43  ;;  %v911_v36 = vmul.f32 %v3042_v5, %v3112_v43  ;;  %v1019_v37 = vrot.slane %v3107_v3, 1 }
 0x1a5   : > { %865 = vrot.lane.b32.xlu0 %v852_v35, %s2675_s29  ;;  %v1020_v0 = vrot.slane %v3134_v56, 1  ;;  %v1025_v38 = vrot.slane %v1003_v54, 1  ;;  %v1026_v41 = vrot.slane %v1006_v1, 1  ;;  %v1094_v42 = vrot.slane %v3119_v8, 1 }
 0x1a6   : > { %v1095_v45 = vrot.slane %v3149_v9, 1  ;;  %v1032_v14 = vrot.slane %v3103_v40, 1  ;;  %v1208_v49 = vrot.slane %v1190_v22, 2  ;;  %v1209_v6 = vrot.slane %v3180_v47, 2 }
 0x1a7   : > { %923 = vrot.lane.b32.xlu1 %v909_v13, %s2676_s13  ;;  %v1021_v5 = vsel %vm964_vm4, %v1019_v37, %v1020_v0  ;;  %v3226_v3 = vsel %vm964_vm4, %v1025_v38, %v1026_v41  ;;  %v1100_v50 = vrot.slane %v1078_v15, 1  ;;  %v1101_v56 = vrot.slane %v1081_v7, 1 }
 0x1a8   : > { %v3231_v8 = vsel %vm964_vm4, %v1094_v42, %v1095_v45  ;;  %v3234_v54 = vsel %vm964_vm4, %v1026_v41, %v1032_v14  ;;  %v3239_v40 = vsel %vm1153_vm5, %v1208_v49, %v1209_v6  ;;  %v1002_v13 = vmul.f32 %v3053_v10, %v3097_v2 }
 0x1a9   : > { %921 = vrot.lane.b32.xlu0 %v908_v61, %s2676_s13  ;;  %v3245_v15 = vsel %vm964_vm4, %v1100_v50, %v1101_v56  ;;  %v1005_v52 = vmul.f32 %v3053_v10, %v3112_v43  ;;  %v1107_v57 = vrot.slane %v3115_v44, 1  ;;  %v1077_v1 = vmul.f32 %v3058_v11, %v3097_v2 }
 0x1aa   : > { %v1022_v4 = vrot.slane %v1002_v13, 1  ;;  %v1080_v7 = vmul.f32 %v3058_v11, %v3112_v43  ;;  %v1214_v22 = vrot.slane %v1192_v16, 2  ;;  %v1215_v35 = vrot.slane %v3158_v59, 2 }
 0x1ab   : > { %925 = vrot.lane.b32.xlu1 %v3125_v46, %s2676_s13  ;;  %v1023_v61 = vrot.slane %v1005_v52, 1  ;;  %v3258_v37 = vsel %vm964_vm4, %v1101_v56, %v1107_v57  ;;  %v1097_v38 = vrot.slane %v1077_v1, 1  ;;  %v1191_v44 = vmul.f32 %v3063_v12, %v3097_v2 }
 0x1ac   : > { %v1098_v41 = vrot.slane %v1080_v7, 1  ;;  %v3263_v42 = vsel %vm1153_vm5, %v1214_v22, %v1215_v35  ;;  %v1194_v16 = vmul.f32 %v3063_v12, %v3112_v43  ;;  %v1221_v59 = vrot.slane %v3161_v21, 2 }
 0x1ad   : > { %871 = vrot.lane.b32.xlu0 %v855_v32, %s2675_s29  ;;  %v3270_v46 = vsel %vm964_vm4, %v1022_v4, %v1023_v61  ;;  %v1211_v14 = vrot.slane %v1191_v44, 2  ;;  %v1266_v49 = vmul.f32 %v3069_v62, %v3097_v2  ;;  %v1269_v50 = vmul.f32 %v3069_v62, %v3112_v43 }
 0x1ae   : > { %v3277_v56 = vsel %vm964_vm4, %v1097_v38, %v1098_v41  ;;  %v1212_v13 = vrot.slane %v1194_v16, 2  ;;  %v3280_v52 = vsel %vm1153_vm5, %v1215_v35, %v1221_v59  ;;  %v1289_v21 = vrot.slane %v3187_v55, 2 }
 0x1af   : > { %873 = vrot.lane.b32.xlu1 %v3142_v60, %s2675_s29  ;;  %v1286_v32 = vrot.slane %v1266_v49, 2  ;;  %v1287_v57 = vrot.slane %v1269_v50, 2  ;;  %v1290_v1 = vrot.slane %v3190_v29, 2  ;;  %v1008_v4 = vmul.f32 %v3053_v10, %v3168_v26 }
 0x1b0   : > { %v3289_v7 = vsel %vm1153_vm5, %v1211_v14, %v1212_v13  ;;  %v1296_v22 = vrot.slane %v3193_v25, 2  ;;  %v1083_v35 = vmul.f32 %v3058_v11, %v3168_v26  ;;  %v1028_v55 = vrot.slane %v3172_v33, 1 }
 0x1b1   : > { %927 = vrot.lane.b32.xlu0 %v911_v36, %s2676_s13  ;;  %v3297_v60 = vsel %vm1153_vm5, %v1286_v32, %v1287_v57  ;;  %v3300_v29 = vsel %vm1153_vm5, %v1289_v21, %v1290_v1  ;;  %v1030_v38 = vrot.slane %v1008_v4, 1  ;;  %v1197_v10 = vmul.f32 %v3063_v12, %v3168_v26 }
 0x1b2   : > { %v3305_v44 = vsel %vm1153_vm5, %v1290_v1, %v1296_v22  ;;  %v1105_v25 = vrot.slane %v1083_v35, 1  ;;  %v3308_v11 = vsel %vm964_vm4, %v1020_v0, %v1028_v55  ;;  %v1103_v33 = vrot.slane %v3176_v17, 1 }
 0x1b3   : > { %929 = vrot.lane.b32.xlu1 %v3139_v53, %s2676_s13  ;;  %v1031_v36 = vsel %vm964_vm4, %v1023_v61, %v1030_v38  ;;  %v1219_v16 = vrot.slane %v1197_v10, 2  ;;  %v1272_v59 = vmul.f32 %v3069_v62, %v3168_v26  ;;  %v1217_v12 = vrot.slane %v3184_v23, 2 }
 0x1b4   : > { %v1106_v14 = vsel %vm964_vm4, %v1098_v41, %v1105_v25  ;;  %v1104_v0 = vsel %vm964_vm4, %v1095_v45, %v1103_v33  ;;  %v1283_v49 = vrot.slane %v3197_v34, 2  ;;  %v1284_v17 = vrot.slane %v3201_v31, 2 }
 0x1b5   : > { %1034 = vrot.lane.b32.xlu0 %v1021_v5, %s2675_s29  ;;  %v1220_v53 = vsel %vm1153_vm5, %v1212_v13, %v1219_v16  ;;  %v1294_v61 = vrot.slane %v1272_v59, 2  ;;  %v1218_v62 = vsel %vm1153_vm5, %v1209_v6, %v1217_v12  ;;  %v1292_v23 = vrot.slane %v3205_v48, 2 }
 0x1b6   : > { %v1285_v41 = vsel %vm1153_vm5, %v1283_v49, %v1284_v17  ;;  %v952_v31 = vmul.f32 %v3072_v18, %v3079_v28  ;;  %v953_v45 = vmul.f32 %v3075_v19, %v3097_v2  ;;  %v954_v47 = vmul.f32 %v3072_v18, %v3100_v39 }
 0x1b7   : > { %1038 = vrot.lane.b32.xlu1 %v3226_v3, %s2675_s29  ;;  %v1295_v9 = vsel %vm1153_vm5, %v1287_v57, %v1294_v61  ;;  %v1293_v34 = vsel %vm1153_vm5, %v1284_v17, %v1292_v23  ;;  %v955_v48 = vmul.f32 %v3075_v19, %v3112_v43  ;;  %v1141_v6 = vmul.f32 %v3083_v63, %v3079_v28 }
 0x1b8   : > { %v1142_v5 = vmul.f32 %v3086_v30, %v3097_v2  ;;  %v1143_v3 = vmul.f32 %v3083_v63, %v3100_v39  ;;  %v1144_v50 = vmul.f32 %v3086_v30, %v3112_v43  ;;  %v965_v13 = vrot.slane %v952_v31, 1 }
 0x1b9   : > { %1109 = vrot.lane.b32.xlu0 %v3231_v8, %s2676_s13  ;;  %v966_v21 = vrot.slane %v954_v47, 1  ;;  %v968_v32 = vrot.slane %v953_v45, 1  ;;  %v969_v57 = vrot.slane %v955_v48, 1  ;;  %v1154_v8 = vrot.slane %v1141_v6, 2 }
 0x1ba   : > { %v1155_v1 = vrot.slane %v1143_v3, 2  ;;  %v1157_v4 = vrot.slane %v1142_v5, 2  ;;  %v1158_v22 = vrot.slane %v1144_v50, 2  ;;  %v957_v38 = vmul.f32 %v3075_v19, %v3168_v26 }
 0x1bb   : > { %1044 = vrot.lane.b32.xlu1 %v3234_v54, %s2675_s29  ;;  %v3355_v35 = vsel %vm964_vm4, %v965_v13, %v966_v21  ;;  %v3358_v55 = vsel %vm964_vm4, %v968_v32, %v969_v57  ;;  %v956_v10 = vmul.f32 %v3072_v18, %v3155_v58  ;;  %v1146_v33 = vmul.f32 %v3086_v30, %v3168_v26  ;;  %v2352_v26 = vld [vmem:[#allocation5] sm:$0xff]  }
 0x1bc   : > { %v3367_v54 = vsel %vm1153_vm5, %v1154_v8, %v1155_v1  ;;  %v3370_v25 = vsel %vm1153_vm5, %v1157_v4, %v1158_v22  ;;  %v1145_v16 = vmul.f32 %v3083_v63, %v3155_v58  ;;  %v973_v59 = vrot.slane %v957_v38, 1  ;;  %v2351_v58 = vld [vmem:[#allocation5 + $0x40] sm:$0xff]  }
 0x1bd   : > { %1223 = vrot.lane.b32.xlu0 %v3239_v40, %s2675_s29  ;;  %v971_v19 = vrot.slane %v956_v10, 1  ;;  %v1162_v18 = vrot.slane %v1146_v33, 2  ;;  %2161 = vmatprep.subr.bf16.mxu0 %v2351_v58  ;;  %v823_v61 = vrot.slane %v2932_v27, %v2973_v51 }
 0x1be   : > { %v1160_v12 = vrot.slane %v1145_v16, 2  ;;  %v3379_v40 = vsel %vm964_vm4, %v969_v57, %v973_v59  ;;  %2162 = vmatpush3.bf16.msra.mxu0 %v2352_v26 }
 0x1bf   : > { %1113 = vrot.lane.b32.xlu1 %v3245_v15, %s2676_s13  ;;  %v3382_v49 = vsel %vm964_vm4, %v966_v21, %v971_v19  ;;  %v3387_v30 = vsel %vm1153_vm5, %v1158_v22, %v1162_v18  ;;  %v2353_v15 = vld [vmem:[#allocation5 + $0x48] sm:$0xff]   ;;  %v825_v31 = vmul.f32 %v823_v61, %v3097_v2  ;;  %v827_v38 = vmul.f32 %v823_v61, %v3112_v43 }
 0x1c0   : > { %v3390_v63 = vsel %vm1153_vm5, %v1155_v1, %v1160_v12  ;;  %2163 = vmatprep.subr.bf16.mxu0 %v2353_v15 }
 0x1c1   : > { %1036 = vrot.lane.b32.xlu0 %v3270_v46, %s2675_s29  ;;  %v2356_v46 = vld [vmem:[#allocation5 + $0x10] sm:$0xff]  }
 0x1c3   : > { %1119 = vrot.lane.b32.xlu1 %v3258_v37, %s2676_s13  ;;  %v2354_v37 = vld [vmem:[#allocation5 + $0x8] sm:$0xff]  }
 0x1c4   : > { %2164 = vmatpush3.bf16.msra.mxu0 %v2354_v37 }
 0x1c5   : > { %1111 = vrot.lane.b32.xlu0 %v3277_v56, %s2676_s13  ;;  %v2357_v56 = vld [vmem:[#allocation5 + $0x58] sm:$0xff]  }
 0x1c7   : > { %1227 = vrot.lane.b32.xlu1 %v3263_v42, %s2675_s29  ;;  %v2355_v42 = vld [vmem:[#allocation5 + $0x50] sm:$0xff]  }
 0x1c8   : > { %2165 = vmatprep.subr.bf16.mxu0 %v2355_v42 }
 0x1c9   : > { %1225 = vrot.lane.b32.xlu0 %v3289_v7, %s2675_s29  ;;  %2166 = vmatpush3.bf16.msra.mxu0 %v2356_v46  ;;  %v2359_v7 = vld [vmem:[#allocation5 + $0x60] sm:$0xff]  }
 0x1ca   : > { %2167 = vmatprep.subr.bf16.mxu0 %v2357_v56 }
 0x1cb   : > { %1233 = vrot.lane.b32.xlu1 %v3280_v52, %s2675_s29  ;;  %v2358_v52 = vld [vmem:[#allocation5 + $0x18] sm:$0xff]  }
 0x1cd   : > { %1300 = vrot.lane.b32.xlu0 %v3297_v60, %s2676_s13  ;;  %2168 = vmatpush3.bf16.msra.mxu0 %v2358_v52 }
 0x1ce   : > { %2169 = vmatprep.subr.bf16.mxu0 %v2359_v7 }
 0x1cf   : > { %1302 = vrot.lane.b32.xlu1 %v3300_v29, %s2676_s13  ;;  %v2360_v29 = vld [vmem:[#allocation5 + $0x20] sm:$0xff]  }
 0x1d1   : > { %1042 = vrot.lane.b32.xlu0 %v1031_v36, %s2675_s29  ;;  %2170 = vmatpush3.bf16.msra.mxu0 %v2360_v29 }
 0x1d3   : > { %1308 = vrot.lane.b32.xlu1 %v3305_v44, %s2676_s13  ;;  %v2361_v44 = vld [vmem:[#allocation5 + $0x68] sm:$0xff]  }
 0x1d4   : > { %2171 = vmatprep.subr.bf16.mxu0 %v2361_v44 }
 0x1d5   : > { %1117 = vrot.lane.b32.xlu0 %v1106_v14, %s2676_s13  ;;  %v2362_v14 = vld [vmem:[#allocation5 + $0x28] sm:$0xff]  }
 0x1d6   : > { %2172 = vmatpush3.bf16.msra.mxu0 %v2362_v14 }
 0x1d7   : > { %1040 = vrot.lane.b32.xlu1 %v3308_v11, %s2675_s29 }
 0x1d9   : > { %1231 = vrot.lane.b32.xlu0 %v1220_v53, %s2675_s29  ;;  %v819_v53 = vrot.slane %v2927_v24, %v2973_v51  ;;  %v2366_v24 = vld [vmem:[#allocation5 + $0x38] sm:$0xff]  }
 0x1db   : > { %1115 = vrot.lane.b32.xlu1 %v1104_v0, %s2676_s13  ;;  %v2363_v0 = vld [vmem:[#allocation5 + $0x70] sm:$0xff]   ;;  %v824_v45 = vmul.f32 %v819_v53, %v3079_v28  ;;  %v826_v8 = vmul.f32 %v819_v53, %v3100_v39 }
 0x1dc   : > { %2173 = vmatprep.subr.bf16.mxu0 %v2363_v0 }
 0x1dd   : > { %1306 = vrot.lane.b32.xlu0 %v1295_v9, %s2676_s13 }
 0x1df   : > { %1229 = vrot.lane.b32.xlu1 %v1218_v62, %s2675_s29  ;;  %v2364_v62 = vld [vmem:[#allocation5 + $0x30] sm:$0xff]   ;;  %s3504_s29 = scalar_lea.hbm %s3558_s11, %s2150_s28 }
 0x1e0   : > { %2174 = vmatpush3.bf16.msra.mxu0 %v2364_v62 }
 0x1e1   : > { %1298 = vrot.lane.b32.xlu0 %v1285_v41, %s2676_s13  ;;  %v2365_v41 = vld [vmem:[#allocation5 + $0x78] sm:$0xff]  }
 0x1e2   : > { %2175 = vmatprep.subr.bf16.mxu0 %v2365_v41  ;;  %v793_v41 = vld [vmem:[%s3551_s4] sm:$0x3] }
 0x1e3   : > { %1304 = vrot.lane.b32.xlu1 %v1293_v34, %s2676_s13  ;;  %s3506_s13 = scalar_lea.sflag [#allocation4], %s436_s16 }
 0x1e4   : > { %2176 = vmatpush3.bf16.msra.mxu0 %v2366_v24 }
 0x20d   : > { %v864_v60 = vpop.permute.xlu0 %863 }
 0x211   : > { %v868_v11 = vpop.permute.xlu1 %867 }
 0x212   : > { %v920_v36 = vpop.permute.xlu0 %919 }
 0x215   : > { %v870_v17 = vpop.permute.xlu1 %869 }
 0x217   : > { %v866_v23 = vpop.permute.xlu0 %865 }
 0x218   : > { %v876_v9 = vsel %vm875_vm6, %v864_v60, %v866_v23  ;;  %v877_v34 = vsel %vm875_vm6, %v866_v23, %v868_v11 }
 0x219   : > { %v924_v47 = vpop.permute.xlu1 %923  ;;  %v884_v48 = vadd.f32 %v876_v9, %v824_v45  ;;  %v885_v27 = vadd.f32 %v877_v34, %v825_v31 }
 0x21b   : > { %v922_v6 = vpop.permute.xlu0 %921 }
 0x21c   : > { %v932_v5 = vsel %vm931_vm7, %v920_v36, %v922_v6  ;;  %v933_v3 = vsel %vm931_vm7, %v922_v6, %v924_v47 }
 0x21d   : > { %v940_v50 = vadd.f32 %v932_v5, %v884_v48  ;;  %v941_v13 = vadd.f32 %v933_v3, %v885_v27  ;;  %v926_v21 = vpop.permute.xlu1 %925 }
 0x21f   : > { %v872_v32 = vpop.permute.xlu0 %871  ;;  %v980_v2 = vadd.f32 %v3358_v55, %v941_v13  ;;  %v979_v28 = vadd.f32 %v3355_v35, %v940_v50 }
 0x220   : > { %v878_v57 = vsel %vm875_vm6, %v870_v17, %v872_v32 }
 0x221   : > { %v874_v1 = vpop.permute.xlu1 %873  ;;  %v886_v22 = vadd.f32 %v878_v57, %v826_v8 }
 0x222   : > { %v879_v4 = vsel %vm875_vm6, %v872_v32, %v874_v1 }
 0x223   : > { %v928_v10 = vpop.permute.xlu0 %927  ;;  %v887_v16 = vadd.f32 %v879_v4, %v827_v38 }
 0x224   : > { %v934_v33 = vsel %vm931_vm7, %v926_v21, %v928_v10 }
 0x225   : > { %v942_v59 = vadd.f32 %v934_v33, %v886_v22  ;;  %v930_v19 = vpop.permute.xlu1 %929 }
 0x226   : > { %v935_v55 = vsel %vm931_vm7, %v928_v10, %v930_v19 }
 0x227   : > { %v943_v18 = vadd.f32 %v935_v55, %v887_v16  ;;  %v1035_v35 = vpop.permute.xlu0 %1034  ;;  %v981_v12 = vadd.f32 %v3382_v49, %v942_v59 }
 0x229   : > { %v1039_v58 = vpop.permute.xlu1 %1038  ;;  %v982_v39 = vadd.f32 %v3379_v40, %v943_v18  ;;  %v1326_v18 = vrot.slane %v793_v41, %v2973_v51 }
 0x22b   : > { %v1110_v26 = vpop.permute.xlu0 %1109 }
 0x22d   : > { %v1045_v15 = vpop.permute.xlu1 %1044 }
 0x22f   : > { %v1224_v37 = vpop.permute.xlu0 %1223 }
 0x231   : > { %v1114_v42 = vpop.permute.xlu1 %1113 }
 0x233   : > { %v1037_v43 = vpop.permute.xlu0 %1036 }
 0x234   : > { %v1046_v46 = vsel %vm875_vm6, %v1035_v35, %v1037_v43  ;;  %v1047_v56 = vsel %vm875_vm6, %v1037_v43, %v1039_v58 }
 0x235   : > { %v1120_v52 = vpop.permute.xlu1 %1119  ;;  %v1054_v7 = vadd.f32 %v1046_v46, %v979_v28  ;;  %v1055_v60 = vadd.f32 %v1047_v56, %v980_v2 }
 0x237   : > { %v1112_v29 = vpop.permute.xlu0 %1111 }
 0x238   : > { %v1121_v44 = vsel %vm931_vm7, %v1110_v26, %v1112_v29  ;;  %v1122_v49 = vsel %vm931_vm7, %v1112_v29, %v1114_v42 }
 0x239   : > { %v1129_v11 = vadd.f32 %v1121_v44, %v1054_v7  ;;  %v1130_v36 = vadd.f32 %v1122_v49, %v1055_v60  ;;  %v1228_v40 = vpop.permute.xlu1 %1227 }
 0x23b   : > { %v1169_v14 = vadd.f32 %v3370_v25, %v1130_v36  ;;  %v1226_v0 = vpop.permute.xlu0 %1225  ;;  %v1168_v17 = vadd.f32 %v3367_v54, %v1129_v11  ;;  %v1330_v25 = vrot.slane %v793_v41, %v2920_v20 }
 0x23c   : > { %v1236_v62 = vsel %vm875_vm6, %v1226_v0, %v1228_v40  ;;  %v1235_v38 = vsel %vm875_vm6, %v1224_v37, %v1226_v0 }
 0x23d   : > { %v1234_v53 = vpop.permute.xlu1 %1233  ;;  %v1244_v34 = vadd.f32 %v1236_v62, %v1169_v14  ;;  %v1243_v19 = vadd.f32 %v1235_v38, %v1168_v17  ;;  %v2379_v38 = vld [vmem:[#allocation7 + $0x40] ss:$8 sps:$4 sm:$0xff]  }
 0x23f   : > { %v1301_v61 = vpop.permute.xlu0 %1300 }
 0x241   : > { %v1303_v23 = vpop.permute.xlu1 %1302 }
 0x242   : > { %v1311_v9 = vsel %vm931_vm7, %v1301_v61, %v1303_v23 }
 0x243   : > { %v1043_v31 = vpop.permute.xlu0 %1042  ;;  %v1319_v47 = vadd.f32 %v1311_v9, %v1244_v34 }
 0x244   : > { %v1049_v45 = vsel %vm875_vm6, %v1043_v31, %v1045_v15 }
 0x245   : > { %v1309_v24 = vpop.permute.xlu1 %1308  ;;  %v1057_v54 = vadd.f32 %v1049_v45, %v982_v39  ;;  %v1334_v6 = vadd.f32 %v1330_v25, %v1319_v47 }
 0x247   : > { %v1118_v48 = vpop.permute.xlu0 %1117  ;;  %v2090_v2 = vmul.f32 -1.442695, %v1334_v6 }
 0x248   : > { %v1124_v27 = vsel %vm931_vm7, %v1118_v48, %v1120_v52 }
 0x249   : > { %v1132_v5 = vadd.f32 %v1124_v27, %v1057_v54  ;;  %v1041_v3 = vpop.permute.xlu1 %1040  ;;  %2443 = vpow2.f32 %v2090_v2  ;;  %v2370_v2 = vld [vmem:[#allocation7 + $0x10] ss:$8 sps:$4 sm:$0xff]  }
 0x24a   : > { %v1048_v50 = vsel %vm875_vm6, %v1041_v3, %v1043_v31 }
 0x24b   : > { %v1171_v13 = vadd.f32 %v3387_v30, %v1132_v5  ;;  %v1232_v21 = vpop.permute.xlu0 %1231  ;;  %v1056_v28 = vadd.f32 %v1048_v50, %v981_v12 }
 0x24c   : > { %v1238_v32 = vsel %vm875_vm6, %v1232_v21, %v1234_v53 }
 0x24d   : > { %v1116_v57 = vpop.permute.xlu1 %1115  ;;  %v1246_v1 = vadd.f32 %v1238_v32, %v1171_v13  ;;  %v2367_v32 = vld [vmem:[#allocation7] ss:$8 sps:$4 sm:$0xff]  }
 0x24e   : > { %v1123_v8 = vsel %vm931_vm7, %v1116_v57, %v1118_v48  ;;  %v2375_v57 = vld [vmem:[#allocation7 + $0x24] ss:$8 sps:$4 sm:$0xff]  }
 0x24f   : > { %v1131_v4 = vadd.f32 %v1123_v8, %v1056_v28  ;;  %v1307_v22 = vpop.permute.xlu0 %1306  ;;  %v2372_v28 = vld [vmem:[#allocation7 + $0x14] ss:$8 sps:$4 sm:$0xff]   ;;  %v2373_v8 = vld [vmem:[#allocation7 + $0x20] ss:$8 sps:$4 sm:$0xff]  }
 0x250   : > { %v1313_v10 = vsel %vm931_vm7, %v1307_v22, %v1309_v24 }
 0x251   : > { %v1321_v33 = vadd.f32 %v1313_v10, %v1246_v1  ;;  %v1230_v16 = vpop.permute.xlu1 %1229  ;;  %v1170_v30 = vadd.f32 %v3390_v63, %v1131_v4  ;;  %v2378_v1 = vld [vmem:[#allocation7 + $0x34] ss:$8 sps:$4 sm:$0xff]   ;;  %v2376_v4 = vld [vmem:[#allocation7 + $0x30] ss:$8 sps:$4 sm:$0xff]  }
 0x252   : > { %v1237_v59 = vsel %vm875_vm6, %v1230_v16, %v1232_v21  ;;  %v2369_v21 = vld [vmem:[#allocation7 + $0x4] ss:$8 sps:$4 sm:$0xff]   ;;  %v2384_v10 = vld [vmem:[#allocation7 + $0x54] ss:$8 sps:$4 sm:$0xff]  }
 0x253   : > { %v1336_v55 = vadd.f32 %v1330_v25, %v1321_v33  ;;  %v1299_v35 = vpop.permute.xlu0 %1298  ;;  %v1245_v39 = vadd.f32 %v1237_v59, %v1170_v30  ;;  %v2444_v56 = vpop.eup %2443  ;;  %1666 = vmatprep.subr.bf16.mxu1 %v2369_v21  ;;  %v2382_v33 = vld [vmem:[#allocation7 + $0x50] ss:$8 sps:$4 sm:$0xff]   ;;  %v2387_v16 = vld [vmem:[#allocation7 + $0x64] ss:$8 sps:$4 sm:$0xff]   ;;  %v2385_v30 = vld [vmem:[#allocation7 + $0x60] ss:$8 sps:$4 sm:$0xff]  }
 0x254   : > { %v1310_v12 = vsel %vm931_vm7, %v1299_v35, %v1301_v61  ;;  %v1350_v7 = vadd.f32 1.0, %v2444_v56  ;;  %1667 = vmatpush1.bf16.msra.mxu1 %v2367_v32  ;;  %v2390_v59 = vld [vmem:[#allocation7 + $0x74] ss:$8 sps:$4 sm:$0xff]   ;;  %v2391_v56 = vld [vmem:[#allocation8 + $0x40] sm:$0xff]  }
 0x255   : > { %v2092_v58 = vmul.f32 -1.442695, %v1336_v55  ;;  %v1318_v26 = vadd.f32 %v1310_v12, %v1243_v19  ;;  %v1305_v15 = vpop.permute.xlu1 %1304  ;;  %1668 = vmatprep.subr.bf16.mxu1 %v2372_v28  ;;  %v2388_v19 = vld [vmem:[#allocation7 + $0x70] ss:$8 sps:$4 sm:$0xff]   ;;  %2183 = vmatprep.subr.bf16.mxu0 %v2391_v56 }
 0x256   : > { %v1312_v37 = vsel %vm931_vm7, %v1305_v15, %v1307_v22  ;;  %v2381_v22 = vld [vmem:[#allocation7 + $0x44] ss:$8 sps:$4 sm:$0xff]  }
 0x257   : > { %2445 = vpow2.f32 %v2092_v58  ;;  %v1333_v42 = vadd.f32 %v1326_v18, %v1318_v26  ;;  %v1320_v43 = vadd.f32 %v1312_v37, %v1245_v39 }
 0x258   : > { %1669 = vmatpush1.bf16.msra.mxu1 %v2370_v2 }
 0x259   : > { %v2089_v46 = vmul.f32 -1.442695, %v1333_v42  ;;  %v1335_v63 = vadd.f32 %v1326_v18, %v1320_v43  ;;  %1670 = vmatprep.subr.bf16.mxu1 %v2375_v57  ;;  %v1413_v18 = vld [vmem:[%s3553_s6] sm:$0x1] }
 0x25b   : > { %2447 = vpow2.f32 %v2089_v46  ;;  %v2091_v52 = vmul.f32 -1.442695, %v1335_v63 }
 0x25c   : > { %1671 = vmatpush1.bf16.msra.mxu1 %v2373_v8 }
 0x25d   : > { %2449 = vpow2.f32 %v2091_v52  ;;  %1672 = vmatprep.subr.bf16.mxu1 %v2378_v1  ;;  %v2392_v52 = vld [vmem:[#allocation8] sm:$0xff]  }
 0x25e   : > { %2451 = vrcp.f32 %v1350_v7  ;;  %v2393_v7 = vld [vmem:[#allocation8 + $0x48] sm:$0xff]  }
 0x260   : > { %1673 = vmatpush1.bf16.msra.mxu1 %v2376_v4 }
 0x261   : > { %v2446_v60 = vpop.eup %2445  ;;  %1674 = vmatprep.subr.bf16.mxu1 %v2381_v22 }
 0x262   : > { %v1352_v29 = vadd.f32 1.0, %v2446_v60  ;;  %v2394_v60 = vld [vmem:[#allocation8 + $0x8] sm:$0xff]  }
 0x264   : > { %2453 = vrcp.f32 %v1352_v29  ;;  %1675 = vmatpush1.bf16.msra.mxu1 %v2379_v38  ;;  %v2395_v29 = vld [vmem:[#allocation8 + $0x50] sm:$0xff]  }
 0x265   : > { %v2448_v44 = vpop.eup %2447  ;;  %1676 = vmatprep.subr.bf16.mxu1 %v2384_v10 }
 0x266   : > { %v1349_v49 = vadd.f32 1.0, %v2448_v44  ;;  %v2396_v44 = vld [vmem:[#allocation8 + $0x10] sm:$0xff]  }
 0x267   : > { %v2450_v11 = vpop.eup %2449 }
 0x268   : > { %2455 = vrcp.f32 %v1349_v49  ;;  %v1351_v36 = vadd.f32 1.0, %v2450_v11  ;;  %v2452_v40 = vpop.eup %2451  ;;  %1677 = vmatpush1.bf16.msra.mxu1 %v2382_v33  ;;  %v2397_v49 = vld [vmem:[#allocation8 + $0x58] sm:$0xff]   ;;  %v2471_v33 = vld [vmem:[%s2914_s20] sm:$0xff] }
 0x269   : > { %v3463_v0 = vmul.f32 %v2452_v40, %v1334_v6  ;;  %1678 = vmatprep.subr.bf16.mxu1 %v2387_v16  ;;  %v2398_v11 = vld [vmem:[#allocation8 + $0x18] sm:$0xff]   ;;  %v2400_v40 = vld [vmem:[#allocation8 + $0x20] sm:$0xff]   ;;  %v1912_v16 = vrot.slane %v2471_v33, 1 }
 0x26a   : > { %2457 = vrcp.f32 %v1351_v36  ;;  %v2399_v36 = vld [vmem:[#allocation8 + $0x60] sm:$0xff]  }
 0x26c   : > { %1679 = vmatpush1.bf16.msra.mxu1 %v2385_v30  ;;  %v2472_v30 = vld [vmem:[%s2914_s20 + $0x8] sm:$0xff] }
 0x26d   : > { %1680 = vmatprep.subr.bf16.mxu1 %v2390_v59  ;;  %v1913_v59 = vrot.slane %v2472_v30, 1 }
 0x26e   : > { %v2454_v14 = vpop.eup %2453 }
 0x26f   : > { %v3465_v17 = vmul.f32 %v2454_v14, %v1336_v55  ;;  %v2401_v14 = vld [vmem:[#allocation8 + $0x68] sm:$0xff]  }
 0x270   : > { %1681 = vmatpush1.bf16.msra.mxu1 %v2388_v19  ;;  %v2473_v19 = vld [vmem:[%s2914_s20 + $0x10] sm:$0x3]  ;;  %s438_s20 = scalar_lea.vmem [#allocation10], %s2052_s12 }
 0x271   : > { %v1372_v53 = vadd.f32 %v3465_v17, %v3463_v0  ;;  %s1937_s26 = sshll.u32 %s438_s20, 4  ;;  %s3499_s26 = int_to_ptr.vmem [resolvable:$true] %s1937_s26 }
 0x272   : > { %v2456_v61 = vpop.eup %2455  ;;  %s2586_s30 = scalar_lea.vmem %s3499_s26, 256  ;;  %p2593_p8 = scmp.lt.s32.totalorder %s3499_s26, %s2591_s17 }
 0x273   : > { %v3469_v62 = vmul.f32 %v2456_v61, %v1333_v42  ;;  %v1373_v23 = vrot.slane %v1372_v53, 4  ;;  %v2403_v61 = vld [vmem:[#allocation8 + $0x70] sm:$0xff]   ;;  %p2587_p2 = scmp.ne.s32.totalorder %s3499_s26, %s2586_s30  ;;  %p2594_p11 = scmp.lt.s32.totalorder %s2592_s23, %s2586_s30 }
 0x274   : > { %v2458_v41 = vpop.eup %2457 }
 0x275   : > { %v3471_v9 = vmul.f32 %v2458_v41, %v1335_v63  ;;  %v1374_v34 = vadd.f32 %v1373_v23, %v1372_v53  ;;  %v2402_v53 = vld [vmem:[#allocation8 + $0x28] sm:$0xff]   ;;  %v2404_v23 = vld [vmem:[#allocation8 + $0x30] sm:$0xff]   ;;  %v2405_v41 = vld [vmem:[#allocation8 + $0x78] sm:$0xff]   ;;  %p2588_p4 = pnand %p2587_p2, %p3592_p3  ;;  %p2595_p5 = por %p2594_p11, %p2593_p8 }
 0x277   : > { %v1365_v31 = vadd.f32 %v3471_v9, %v3469_v62  ;;  %v1375_v45 = vrot.slane %v1374_v34, 2  ;;  %p2589_p7 = pneg %p2588_p4 }
 0x279   : > { %v1366_v25 = vrot.slane %v1365_v31, 4  ;;  %v1376_v47 = vadd.f32 %v1375_v45, %v1374_v34  ;;  %v2406_v34 = vld [vmem:[#allocation8 + $0x38] sm:$0xff]   ;;  %p2596_p0 = pnand %p2595_p5, %p2589_p7 }
 0x27b   : > { %v1367_v24 = vadd.f32 %v1366_v25, %v1365_v31  ;;  %v1377_v54 = vrot.slane %v1376_v47, 1  ;;  %v1574_v31 = vld [vmem:[%s3555_s8] sm:$0x3] }
 0x27c   : > { %v1659_v45 = vrot.slane %v1574_v31, %v2973_v51  ;;  %v1663_v25 = vrot.slane %v1574_v31, %v2920_v20 }
 0x27d   : > { %v1368_v48 = vrot.slane %v1367_v24, 2  ;;  %v1378_v27 = vadd.f32 %v1377_v54, %v1376_v47 }
 0x27f   : > { %v1369_v6 = vadd.f32 %v1368_v48, %v1367_v24  ;;  %v1380_v5 = vpack.c.bf16 %v1378_v27, %v1378_v27 }
 0x281   : > { %1542 = vmatprep.mubr.bf16.mxu0 %v1380_v5  ;;  %v1370_v3 = vrot.slane %v1369_v6, 1 }
 0x283   : > { %v1371_v50 = vadd.f32 %v1370_v3, %v1369_v6 }
 0x285   : > { %v1379_v13 = vpack.c.bf16 %v1371_v50, %v1371_v50 }
 0x287   : > { %1543 = vmatmul.mubr.bf16.vlgmr.msra.gmra.mrb[8].mxu0 %v1379_v13 }
 0x288   : > { %2184 = vmatpush3.bf16.msra.mxu0 %v2392_v52 }
 0x289   : > { %2185 = vmatprep.subr.bf16.mxu0 %v2393_v7 }
 0x28c   : > { %2186 = vmatpush3.bf16.msra.mxu0 %v2394_v60 }
 0x28d   : > { %2187 = vmatprep.subr.bf16.mxu0 %v2395_v29 }
 0x290   : > { %2188 = vmatpush3.bf16.msra.mxu0 %v2396_v44 }
 0x291   : > { %2189 = vmatprep.subr.bf16.mxu0 %v2397_v49 }
 0x294   : > { %2190 = vmatpush3.bf16.msra.mxu0 %v2398_v11 }
 0x295   : > { %2191 = vmatprep.subr.bf16.mxu0 %v2399_v36 }
 0x298   : > { %2192 = vmatpush3.bf16.msra.mxu0 %v2400_v40 }
 0x299   : > { %2193 = vmatprep.subr.bf16.mxu0 %v2401_v14 }
 0x29c   : > { %2194 = vmatpush3.bf16.msra.mxu0 %v2402_v53 }
 0x29d   : > { %2195 = vmatprep.subr.bf16.mxu0 %v2403_v61 }
 0x2a0   : > { %2196 = vmatpush3.bf16.msra.mxu0 %v2404_v23 }
 0x2a1   : > { %2197 = vmatprep.subr.bf16.mxu0 %v2405_v41 }
 0x2a4   : > { %2198 = vmatpush3.bf16.msra.mxu0 %v2406_v34 }
 0x35a   : > { %v2177_v55 = vpop.f32.mrb[8].mxu0 }
 0x35b   : > { %v2178_v35 = vpop.f32.mrb[9].mxu0 }
 0x35c   : > { %v2179_v12 = vadd.f32 %v2178_v35, %v2177_v55  ;;  %v2180_v58 = vpop.f32.mrb[10].mxu0 }
 0x35d   : > { %v2181_v39 = vpop.f32.mrb[11].mxu0 }
 0x35e   : > { %v1545_v26 = vadd.f32 %v2179_v12, %v1413_v18 }
 0x360   : > { %v2109_v15 = vmul.f32 -1.442695, %v1545_v26 }
 0x362   : > { %2459 = vpow2.f32 %v2109_v15 }
 0x36c   : > { %v2460_v37 = vpop.eup %2459 }
 0x36d   : > { %v1553_v42 = vadd.f32 1.0, %v2460_v37 }
 0x36f   : > { %2461 = vrcp.f32 %v1553_v42 }
 0x379   : > { %v2462_v43 = vpop.eup %2461 }
 0x37a   : > { %v1556_v46 = vmul.f32 %v2462_v43, %v1545_v26 }
 0x37c   : > { %v1557_v63 = vpack.c.bf16 %v1556_v46, %v1556_v46 }
 0x37e   : > { %1699 = vmatmul.mubr.bf16.vlgmr.msra.gmra.mrb[4].mxu1 %v1557_v63 }
 0x451   : > { %v1700_v47 = vpop.f32.mrb[4].mxu1 }
 0x452   : > { %v1701_v24 = vadd.f32 %v1700_v47, %v1659_v45  ;;  %v1702_v54 = vpop.f32.mrb[5].mxu1 }
 0x453   : > { %v1703_v48 = vadd.f32 %v1702_v54, %v1663_v25  ;;  %v1704_v27 = vpop.f32.mrb[6].mxu1 }
 0x454   : > { %v2126_v6 = vmul.f32 -1.442695, %v1701_v24  ;;  %v1705_v5 = vpop.f32.mrb[7].mxu1 }
 0x455   : > { %v2127_v3 = vmul.f32 -1.442695, %v1703_v48 }
 0x456   : > { %2463 = vpow2.f32 %v2126_v6 }
 0x457   : > { %2465 = vpow2.f32 %v2127_v3 }
 0x460   : > { %v2464_v50 = vpop.eup %2463 }
 0x461   : > { %v2466_v13 = vpop.eup %2465  ;;  %v1713_v21 = vadd.f32 1.0, %v2464_v50 }
 0x462   : > { %v1714_v32 = vadd.f32 1.0, %v2466_v13 }
 0x463   : > { %2467 = vrcp.f32 %v1713_v21 }
 0x464   : > { %2469 = vrcp.f32 %v1714_v32 }
 0x46d   : > { %v2468_v2 = vpop.eup %2467 }
 0x46e   : > { %v2470_v20 = vpop.eup %2469  ;;  %v1722_v28 = vrot.slane %v2468_v2, %v2973_v51 }
 0x46f   : > { %v1726_v57 = vrot.slane %v2470_v20, %v2973_v51  ;;  %v1915_v51 = vrot.slane %v2473_v19, 1 }
 0x470   : > { %v1727_v8 = vmul.f32 %v1722_v28, %v3469_v62  ;;  %v1729_v1 = vmul.f32 %v1722_v28, %v3471_v9  ;;  %v1914_v62 = vsel %vm964_vm4, %v1912_v16, %v1913_v59 }
 0x471   : > { %v1728_v4 = vmul.f32 %v1726_v57, %v3463_v0  ;;  %v1730_v22 = vmul.f32 %v1726_v57, %v3465_v17  ;;  %v1916_v55 = vsel %vm964_vm4, %v1913_v59, %v1915_v51  ;;  %v2128_v17 = vld [vmem:[%s3557_s10] ss:$0 sm:$0xff] }
 0x472   : > { %v1731_v10 = vpack.c.bf16 %v1729_v1, %v1727_v8 }
 0x473   : > { %v1732_v38 = vpack.c.bf16 %v1730_v22, %v1728_v4 }
 0x475   : > { %1900 = vmatprep.mubr.bf16.mxu0 %v1732_v38 }
 0x476   : > { %1901 = vmatmul.mubr.bf16.vlgmr.msra.gmra.mrb[12].mxu0 %v1731_v10 }
 0x549   : > { %v2199_v0 = vpop.f32.mrb[12].mxu0 }
 0x54a   : > { %v2200_v9 = vpop.f32.mrb[13].mxu0 }
 0x54b   : > { %v2201_v18 = vadd.f32 %v2200_v9, %v2199_v0  ;;  %v2202_v35 = vpop.f32.mrb[14].mxu0 }
 0x54c   : > { %v2203_v12 = vpop.f32.mrb[15].mxu0 }
 0x54d   : > { %v1903_v58 = vadd.f32 %v2201_v18, %v2128_v17  ;;  %v2204_v39 = vadd.f32 %v2203_v12, %v2202_v35 }
 0x54f   : > { %v1919_v26 = vadd.f32 %v1914_v62, %v1903_v58  ;;  %v1906_v15 = vadd.f32 %v2204_v39, %v2128_v17 }
 0x551   : > { %1921 = vst [vmem:[%s438_s20] sm:$0xff] %v1919_v26  ;;  %v1920_v37 = vadd.f32 %v1916_v55, %v1906_v15 }
 0x553   : > { %1922 = vst [vmem:[%s438_s20 + $0x8] sm:$0xff] %v1920_v37 }
 0x554   : > { %2599 = shalt.err (!%p2596_p0)
}
 0x555   : > { %s2600_s19 = scalar_lea.hbm %s3504_s29, 256  ;;  %s2604_s16 = scalar_lea.hbm %s3558_s11, 512 }
 0x556   : > { %p2601_p6 = scmp.ne.s32.totalorder %s3504_s29, %s2600_s19  ;;  %p2605_p13 = scmp.lt.u32.totalorder %s3504_s29, %s3558_s11 }
 0x557   : > { %p2606_p12 = scmp.lt.u32.totalorder %s2604_s16, %s2600_s19  ;;  %p2608_p2 = scmp.lt.u32.totalorder %s2600_s19, %s3504_s29 }
 0x558   : > { %p2602_p9 = pnand %p2601_p6, %p3592_p3 }
 0x559   : > { %p2607_p1 = por %p2606_p12, %p2605_p13 }
 0x55a   : > { %p2603_p10 = pneg %p2602_p9 }
 0x55b   : > { %p2609_p4 = por %p2608_p2, %p2607_p1 }
 0x55d   : > { %p2610_p7 = pnand %p2609_p4, %p2603_p10 }
 0x55f   : > { %2613 = shalt.err (!%p2610_p7)
}
 0x560   : > { %s2678_s24 = smov 128   ;;  %s2679_s20 = smov 8  }
 0x561   : > { %2242 = dma.vmem_to_hbm [thread:$0]  (%p3592_p3), %s3499_s26, 256, %s3504_s29, %s3506_s13, %s2678_s24, %s2678_s24, %s2679_s20  }
 0x562 PF: > { %s3593_s28 = sld [smem:[#allocation17_spill]]  ;;  %s3594_s5 = sld [smem:[#allocation15_spill]] }
 0x563   : > { %s3595_s22 = sld [smem:[#allocation20_spill]] }
 0x568   : > { %p2269_p8 = scmp.ge.s32.totalorder %s3593_s28, 2  ;;  %s1952_s30 = sand.u32 1, %s3594_s5  }
 0x569   : > { %p3596_p11 = scmp.ne.s32.totalorder %s3595_s22, 0  ;;  %s1953_s21 = scalar_lea.sflag [#allocation4], %s1952_s30 }
 0x56b   : > { %p2258_p5 = pnand %p2269_p8, %p3596_p11 }
 0x56d   : > { %2643 = dma.done.wait (!%p2258_p5), %s1953_s21, 256  }
 0x56e   : > { %2645 = vsyncadd (!%p2258_p5), %s1953_s21, 4294967040  ;;  %s3597_s20 = sld [smem:[#allocation18_spill]]  ;;  %s3598_s23 = sld [smem:[#allocation16_spill]] }
 0x56f   : > { %s3599_s19 = sld [smem:[#allocation19_spill]]  ;;  %s3600_s17 = smov %s2652_s18 }
 0x574   : > { %p24_p0 = scmp.ge.s32.totalorder %s3597_s20, 4   ;;  %s3601_s18 = smov %s3598_s23 }
 0x576   :  { %26 = sbr.rel (!%p24_p0) target bundleno = 8 (0x8), region = 116 }
 0x57d   :  { %1958 = vsyncpa [#allocation3], 1 }
 0x57e   :  { %1960 = vsyncpa [#allocation3 + $0x1], 1 }
 0x57f   :  { %1961 = vsyncpa [#allocation6], 1 }
 0x580   :  { %1962 = vsyncpa [#allocation9], 1 }
 0x581   :  { %1963 = vsyncpa [#allocation4], 1 }
 0x582   :  { %1965 = vsyncpa [#allocation4 + $0x1], 1 }

</bundles_post_ra>
